<compile_context>
chip_gen: v7x
topology: tpu7x:2x2x1
jax: 0.10.0
libtpu: 0.0.40
codegen_flags: <defaults>
</compile_context>

<pallas_src>
import math
import functools

import jax
import jax.numpy as jnp
from jax.experimental import pallas as pl
from jax.experimental.pallas import tpu as pltpu

_LOG2E = 1.4426950408889634


# ------------------------------ small helpers --------------------------------
def _vmem_limit_bytes():
    """~80% of physical VMEM (v7x: ~51 MiB of 64; v5e/v6e: ~102 MiB of 128)."""
    try:
        cap = int(pltpu.get_tpu_info().vmem_capacity_bytes)
        return max(32 * 1024 * 1024, int(cap * 0.8))
    except Exception:  # noqa: BLE001 - info query unavailable on some builds
        return 64 * 1024 * 1024


def _pick_tile(S, t=None):
    """Largest (8-aligned) sequence tile dividing S; prefers big tiles."""
    if t is not None and S % t == 0 and (t % 8 == 0 or t == S):
        return t
    for cand in (512, 256, 128, 64, 32, 16, 8):
        if S % cand == 0:
            return cand
    return S


def _weight_spec(shape, single_buffer):
    """Grid-invariant (replicated) block; single-buffered when supported."""
    idx = lambda b, i: (0,) * len(shape)  # noqa: E731
    if single_buffer:
        return pl.BlockSpec(shape, idx, pipeline_mode=pl.Buffered(1))
    return pl.BlockSpec(shape, idx)


def prepare_params(params):
    """Cast matmul weight matrices to bf16 once (no-op if already bf16)."""
    bf16 = jnp.bfloat16
    out = dict(params)
    for name in ("wq", "wk", "wv", "wo", "w1", "w2"):
        w = out[name]
        if w.dtype != bf16:
            out[name] = w.astype(bf16)
    return out


# --------------------------- K/V projection pre-pass --------------------------
def _kv_project_kernel(x_ref, wk_ref, bk_ref, wv_ref, bv_ref, k_ref, v_ref):
    f32 = jnp.float32
    xb = x_ref[0]                                             # (ts, D) bf16
    k = jnp.dot(xb, wk_ref[...], preferred_element_type=f32) + bk_ref[...]
    v = jnp.dot(xb, wv_ref[...], preferred_element_type=f32) + bv_ref[...]
    k_ref[0] = k.astype(k_ref.dtype)
    v_ref[0] = v.astype(v_ref.dtype)


def _project_kv(x_bf16, params, *, ts, single_buffer, vmem_limit):
    B, S, D = x_bf16.shape
    n_s = S // ts
    wk, bk, wv, bv = params["wk"], params["bk"], params["wv"], params["bv"]

    flops = 4 * B * S * D * D
    bytes_accessed = (int(x_bf16.nbytes) + int(wk.nbytes) + int(wv.nbytes)
                      + int(bk.nbytes) + int(bv.nbytes) + 2 * B * S * D * 2)

    return pl.pallas_call(
        _kv_project_kernel,
        out_shape=(jax.ShapeDtypeStruct((B, S, D), jnp.bfloat16),
                   jax.ShapeDtypeStruct((B, S, D), jnp.bfloat16)),
        grid_spec=pltpu.PrefetchScalarGridSpec(
            num_scalar_prefetch=0,
            grid=(B, n_s),
            in_specs=[
                pl.BlockSpec((1, ts, D), lambda b, si: (b, si, 0)),
                _weight_spec((D, D), single_buffer),
                _weight_spec((1, D), single_buffer),
                _weight_spec((D, D), single_buffer),
                _weight_spec((1, D), single_buffer),
            ],
            out_specs=(pl.BlockSpec((1, ts, D), lambda b, si: (b, si, 0)),
                       pl.BlockSpec((1, ts, D), lambda b, si: (b, si, 0))),
        ),
        compiler_params=pltpu.CompilerParams(
            dimension_semantics=("parallel", "parallel"),
            vmem_limit_bytes=vmem_limit),
        cost_estimate=pl.CostEstimate(flops=int(flops), transcendentals=0,
                                      bytes_accessed=int(bytes_accessed)),
    )(x_bf16, wk, bk, wv, bv)


# ------------------------- main attention + FFN kernel ------------------------
def encoder_layer_kernel(
    xq_ref, k_ref, v_ref, mask_ref,
    wq_ref, bq_ref, wo_ref, bo_ref,
    g1_ref, beta1_ref,
    w1_ref, b1_ref, w2_ref, b2_ref,
    g2_ref, beta2_ref,
    o_ref,
    *, num_heads, d_k, eps,
):
    f32, bf16 = jnp.float32, jnp.bfloat16

    xq = xq_ref[0].astype(f32)            # (tq, D) query / residual tile, f32
    k_full = k_ref[0]                     # (S, D) bf16, precomputed K
    v_full = v_ref[0]                     # (S, D) bf16, precomputed V
    tq, D = xq.shape
    S = k_full.shape[0]

    # Additive mask bias: 0 keep / -1e9 masked.  Applied in the log2-scaled
    # score domain; exp2(-1e9) == 0, equivalent to masked_fill after softmax.
    bias = (mask_ref[...].astype(f32) - 1.0) * 1e9            # (1, S)

    # 1/sqrt(d_k) and log2(e) folded into q so softmax uses exp2 directly.
    scale = _LOG2E / math.sqrt(d_k)
    q = (jnp.dot(xq.astype(bf16), wq_ref[...], preferred_element_type=f32)
         + bq_ref[...]) * scale                               # (tq, D) f32

    # --- batched-head attention (no per-head slicing / concatenate) ----------
    qh = q.astype(bf16).reshape(tq, num_heads, d_k)
    kh = k_full.reshape(S, num_heads, d_k)
    vh = v_full.reshape(S, num_heads, d_k)
    s = jnp.einsum("qhd,khd->hqk", qh, kh, preferred_element_type=f32)
    s = s + bias[None]                                        # (H, tq, S)
    m = jnp.max(s, axis=-1, keepdims=True)
    e = jnp.exp2(s - m)
    p = e * pl.reciprocal(jnp.sum(e, axis=-1, keepdims=True), approx=True)
    attn = jnp.einsum("hqk,khd->qhd", p.astype(bf16), vh,
                      preferred_element_type=f32).reshape(tq, D)
    attn = (jnp.dot(attn.astype(bf16), wo_ref[...], preferred_element_type=f32)
            + bo_ref[...])

    # --- residual + LayerNorm 1 (f32) -----------------------------------------
    h1 = xq + attn
    mu1 = jnp.mean(h1, axis=-1, keepdims=True)
    var1 = jnp.mean((h1 - mu1) ** 2, axis=-1, keepdims=True)
    y1 = (h1 - mu1) * jax.lax.rsqrt(var1 + eps) * g1_ref[...] + beta1_ref[...]

    # --- position-wise feed-forward -------------------------------------------
    f = jnp.dot(y1.astype(bf16), w1_ref[...], preferred_element_type=f32) + b1_ref[...]
    f = jnp.maximum(f, 0.0)
    ff = jnp.dot(f.astype(bf16), w2_ref[...], preferred_element_type=f32) + b2_ref[...]

    # --- residual + LayerNorm 2 (f32) -----------------------------------------
    h2 = y1 + ff
    mu2 = jnp.mean(h2, axis=-1, keepdims=True)
    var2 = jnp.mean((h2 - mu2) ** 2, axis=-1, keepdims=True)
    y2 = (h2 - mu2) * jax.lax.rsqrt(var2 + eps) * g2_ref[...] + beta2_ref[...]

    o_ref[0] = y2.astype(o_ref.dtype)


def _attention_ffn_call(x, k, v, mask, params, *, num_heads, eps, tq,
                        single_buffer, vmem_limit):
    B, S, D = x.shape
    d_k = D // num_heads
    d_ff = params["w1"].shape[1]
    n_q = S // tq

    kernel = functools.partial(encoder_layer_kernel,
                               num_heads=num_heads, d_k=d_k, eps=eps)
    ws = functools.partial(_weight_spec, single_buffer=single_buffer)

    in_specs = [
        pl.BlockSpec((1, tq, D), lambda b, qi: (b, qi, 0)),   # x query/residual
        pl.BlockSpec((1, S, D), lambda b, qi: (b, 0, 0)),     # K (bf16, full seq)
        pl.BlockSpec((1, S, D), lambda b, qi: (b, 0, 0)),     # V (bf16, full seq)
        pl.BlockSpec((1, S), lambda b, qi: (b, 0)),           # key-padding mask
        ws((D, D)), ws((1, D)),                               # W_q, b_q
        ws((D, D)), ws((1, D)),                               # W_o, b_o
        ws((1, D)), ws((1, D)),                               # norm1 gamma, beta
        ws((D, d_ff)), ws((1, d_ff)),                         # fc1
        ws((d_ff, D)), ws((1, D)),                            # fc2
        ws((1, D)), ws((1, D)),                               # norm2 gamma, beta
    ]

    # Accurate per-call work: Q & O projections, scores, attn*V, FFN.
    flops = (4 * B * S * D * D + 4 * B * S * S * D + 4 * B * S * D * d_ff)
    weight_names = ("wq", "bq", "wo", "bo", "g1", "beta1",
                    "w1", "b1", "w2", "b2", "g2", "beta2")
    bytes_accessed = (2 * int(x.nbytes) + int(k.nbytes) + int(v.nbytes)
                      + int(mask.nbytes)
                      + sum(int(params[n].nbytes) for n in weight_names))
    cost = pl.CostEstimate(flops=int(flops),
                           transcendentals=int(B * num_heads * S * S),
                           bytes_accessed=int(bytes_accessed))

    return pl.pallas_call(
        kernel,
        out_shape=jax.ShapeDtypeStruct((B, S, D), x.dtype),
        grid_spec=pltpu.PrefetchScalarGridSpec(
            num_scalar_prefetch=0,
            grid=(B, n_q),
            in_specs=in_specs,
            out_specs=pl.BlockSpec((1, tq, D), lambda b, qi: (b, qi, 0)),
        ),
        compiler_params=pltpu.CompilerParams(
            dimension_semantics=("parallel", "parallel"),
            vmem_limit_bytes=vmem_limit),
        cost_estimate=cost,
    )(x, k, v, mask,
      params["wq"], params["bq"], params["wo"], params["bo"],
      params["g1"], params["beta1"],
      params["w1"], params["b1"], params["w2"], params["b2"],
      params["g2"], params["beta2"])


# ------------------------------ host wrapper ----------------------------------
def encoder_layer(x, mask, params, *, num_heads, eps=1e-5, tq=None):
    B, S, D = x.shape
    assert D % num_heads == 0, "d_model must be divisible by num_heads"
    tq = _pick_tile(S, tq)
    vmem_limit = _vmem_limit_bytes()

    params = prepare_params(params)            # no-op if weights already bf16
    x_bf16 = x.astype(jnp.bfloat16)            # K/V source: halve DMA bytes

    def run(single_buffer):
        k, v = _project_kv(x_bf16, params, ts=tq,
                           single_buffer=single_buffer, vmem_limit=vmem_limit)
        return _attention_ffn_call(x, k, v, mask, params,
                                   num_heads=num_heads, eps=eps, tq=tq,
                                   single_buffer=single_buffer,
                                   vmem_limit=vmem_limit)

    try:
        # Preferred: grid-invariant weights single-buffered (pl.Buffered(1)).
        return run(single_buffer=True)
    except Exception:  # noqa: BLE001 - only the buffering hint differs;
        # identical math with default double-buffering; genuine errors re-raise.
        return run(single_buffer=False)


# ------------------------- pure-JAX reference ----------------------------------
def reference_encoder_layer(x, mask, p, *, num_heads, eps=1e-5):
    B, S, D = x.shape
    d_k = D // num_heads
    pf = {k: jnp.asarray(v, jnp.float32) for k, v in p.items()}

    def ln(h, g, b):
        mu = jnp.mean(h, -1, keepdims=True)
        var = jnp.mean((h - mu) ** 2, -1, keepdims=True)
        return (h - mu) / jnp.sqrt(var + eps) * g + b

    q = x @ pf["wq"] + pf["bq"]
    k = x @ pf["wk"] + pf["bk"]
    v = x @ pf["wv"] + pf["bv"]

    def split(t):  # (B,S,D) -> (B,H,S,d_k)
        return t.reshape(B, S, num_heads, d_k).transpose(0, 2, 1, 3)

    qh, kh, vh = split(q), split(k), split(v)
    scores = jnp.einsum("bhqd,bhkd->bhqk", qh, kh) / math.sqrt(d_k)
    scores = jnp.where(mask[:, None, None, :] == 0, -1e9, scores)
    probs = jax.nn.softmax(scores, axis=-1)
    attn = jnp.einsum("bhqk,bhkd->bhqd", probs, vh)
    attn = attn.transpose(0, 2, 1, 3).reshape(B, S, D)
    attn = attn @ pf["wo"] + pf["bo"]

    y1 = ln(x + attn, pf["g1"], pf["beta1"])
    ff = jnp.maximum(y1 @ pf["w1"] + pf["b1"], 0.0) @ pf["w2"] + pf["b2"]
    return ln(y1 + ff, pf["g2"], pf["beta2"])


if __name__ == "__main__":
    # (8,128)-aligned small shapes: lane-dense stores, MXU-native d_k.
    B, S, D, H, D_FF = 2, 128, 256, 2, 512

    key = jax.random.PRNGKey(0)
    keys = jax.random.split(key, 14)

    def init(k, shape, scale=0.05):
        return (scale * jax.random.normal(k, shape)).astype(jnp.float32)

    params = {
        "wq": init(keys[0], (D, D)), "bq": init(keys[1], (1, D)),
        "wk": init(keys[2], (D, D)), "bk": init(keys[3], (1, D)),
        "wv": init(keys[4], (D, D)), "bv": init(keys[5], (1, D)),
        "wo": init(keys[6], (D, D)), "bo": init(keys[7], (1, D)),
        "g1": jnp.ones((1, D), jnp.float32), "beta1": jnp.zeros((1, D), jnp.float32),
        "w1": init(keys[8], (D, D_FF)), "b1": init(keys[9], (1, D_FF)),
        "w2": init(keys[10], (D_FF, D)), "b2": init(keys[11], (1, D)),
        "g2": jnp.ones((1, D), jnp.float32), "beta2": jnp.zeros((1, D), jnp.float32),
    }

    x = jax.random.normal(keys[12], (B, S, D), jnp.float32)
    # key-padding mask: last 32 key positions of batch element 1 are masked out
    mask = jnp.ones((B, S), jnp.float32).at[1, -32:].set(0.0)

    # Weights cast to bf16 once, outside the call (no per-call HBM re-cast).
    kernel_params = prepare_params(params)

    out = encoder_layer(x, mask, kernel_params, num_heads=H)   # tq = S = 128
    out = jax.block_until_ready(out)

    ref = reference_encoder_layer(x, mask, params, num_heads=H)
    assert out.shape == (B, S, D)
    # bf16 MXU operands (f32 accumulation) + approx reciprocal vs f32 reference.
    assert jnp.allclose(out, ref, atol=5e-2, rtol=5e-2), (
        "mismatch vs reference, max abs err = %f"
        % float(jnp.max(jnp.abs(out - ref))))

    print("KERNEL_OK")
</pallas_src>

<mosaic_0001>
module attributes {stable_mosaic.version = 11 : i64} {
  func.func @_kv_project_kernel(%arg0: i32, %arg1: i32, %arg2: memref<1x128x256xbf16, #tpu.memory_space<vmem>>, %arg3: memref<256x256xbf16, #tpu.memory_space<vmem>>, %arg4: memref<1x256xf32, #tpu.memory_space<vmem>>, %arg5: memref<256x256xbf16, #tpu.memory_space<vmem>>, %arg6: memref<1x256xf32, #tpu.memory_space<vmem>>, %arg7: memref<1x128x256xbf16, #tpu.memory_space<vmem>>, %arg8: memref<1x128x256xbf16, #tpu.memory_space<vmem>>) attributes {dimension_semantics = [#tpu.dimension_semantics<parallel>, #tpu.dimension_semantics<parallel>], iteration_bounds = array<i64: 2, 1>, scalar_prefetch = 0 : i64, scratch_operands = 0 : i64, tpu.core_type = #tpu.core_type<tc>, window_params = [{transform_indices = @transform_0, window_bounds = array<i64: 1, 128, 256>}, {pipeline_mode = #tpu.pipeline_mode<synchronous>, transform_indices = @transform_1, window_bounds = array<i64: 256, 256>}, {pipeline_mode = #tpu.pipeline_mode<synchronous>, transform_indices = @transform_2, window_bounds = array<i64: 1, 256>}, {pipeline_mode = #tpu.pipeline_mode<synchronous>, transform_indices = @transform_3, window_bounds = array<i64: 256, 256>}, {pipeline_mode = #tpu.pipeline_mode<synchronous>, transform_indices = @transform_4, window_bounds = array<i64: 1, 256>}, {transform_indices = @transform_5, window_bounds = array<i64: 1, 128, 256>}, {transform_indices = @transform_6, window_bounds = array<i64: 1, 128, 256>}]} {
    %c0 = arith.constant 0 : index
    %c0_0 = arith.constant 0 : index
    %c0_1 = arith.constant 0 : index
    %0 = vector.load %arg2[%c0, %c0_0, %c0_1] : memref<1x128x256xbf16, #tpu.memory_space<vmem>>, vector<1x128x256xbf16>
    %1 = vector.shape_cast %0 : vector<1x128x256xbf16> to vector<128x256xbf16>
    %c0_2 = arith.constant 0 : index
    %c0_3 = arith.constant 0 : index
    %2 = vector.load %arg3[%c0_2, %c0_3] : memref<256x256xbf16, #tpu.memory_space<vmem>>, vector<256x256xbf16>
    %cst = arith.constant dense<0.000000e+00> : vector<128x256xf32>
    %3 = tpu.matmul %1, %2, %cst {dimension_numbers = #tpu.dot_dimension_numbers<[1], [0], [0], [1], [0, 0, 1, 1], [], []>} : vector<128x256xbf16>, vector<256x256xbf16>, vector<128x256xf32> -> vector<128x256xf32>
    %c0_4 = arith.constant 0 : index
    %c0_5 = arith.constant 0 : index
    %4 = vector.load %arg4[%c0_4, %c0_5] : memref<1x256xf32, #tpu.memory_space<vmem>>, vector<1x256xf32>
    %5 = vector.broadcast %4 : vector<1x256xf32> to vector<128x256xf32>
    %6 = arith.addf %3, %5 : vector<128x256xf32>
    %c0_6 = arith.constant 0 : index
    %c0_7 = arith.constant 0 : index
    %7 = vector.load %arg5[%c0_6, %c0_7] : memref<256x256xbf16, #tpu.memory_space<vmem>>, vector<256x256xbf16>
    %cst_8 = arith.constant dense<0.000000e+00> : vector<128x256xf32>
    %8 = tpu.matmul %1, %7, %cst_8 {dimension_numbers = #tpu.dot_dimension_numbers<[1], [0], [0], [1], [0, 0, 1, 1], [], []>} : vector<128x256xbf16>, vector<256x256xbf16>, vector<128x256xf32> -> vector<128x256xf32>
    %c0_9 = arith.constant 0 : index
    %c0_10 = arith.constant 0 : index
    %9 = vector.load %arg6[%c0_9, %c0_10] : memref<1x256xf32, #tpu.memory_space<vmem>>, vector<1x256xf32>
    %10 = vector.broadcast %9 : vector<1x256xf32> to vector<128x256xf32>
    %11 = arith.addf %8, %10 : vector<128x256xf32>
    %12 = arith.truncf %6 : vector<128x256xf32> to vector<128x256xbf16>
    %c0_11 = arith.constant 0 : index
    %c0_12 = arith.constant 0 : index
    %c0_13 = arith.constant 0 : index
    %13 = vector.load %arg7[%c0_11, %c0_12, %c0_13] : memref<1x128x256xbf16, #tpu.memory_space<vmem>>, vector<1x128x256xbf16>
    %14 = vector.shape_cast %13 : vector<1x128x256xbf16> to vector<128x256xbf16>
    %15 = vector.shape_cast %12 : vector<128x256xbf16> to vector<1x128x256xbf16>
    tpu.vector_store %arg7[%c0_11, %c0_12, %c0_13], %15 {strides = array<i32>} : memref<1x128x256xbf16, #tpu.memory_space<vmem>>, vector<1x128x256xbf16>,
    %16 = arith.truncf %11 : vector<128x256xf32> to vector<128x256xbf16>
    %c0_14 = arith.constant 0 : index
    %c0_15 = arith.constant 0 : index
    %c0_16 = arith.constant 0 : index
    %17 = vector.load %arg8[%c0_14, %c0_15, %c0_16] : memref<1x128x256xbf16, #tpu.memory_space<vmem>>, vector<1x128x256xbf16>
    %18 = vector.shape_cast %17 : vector<1x128x256xbf16> to vector<128x256xbf16>
    %19 = vector.shape_cast %16 : vector<128x256xbf16> to vector<1x128x256xbf16>
    tpu.vector_store %arg8[%c0_14, %c0_15, %c0_16], %19 {strides = array<i32>} : memref<1x128x256xbf16, #tpu.memory_space<vmem>>, vector<1x128x256xbf16>,
    return
  }
  func.func @transform_0(%arg0: i32, %arg1: i32) -> (i32, i32, i32) {
    %c0_i32 = arith.constant 0 : i32
    %c0_i32_0 = arith.constant 0 : i32
    return %arg0, %arg1, %c0_i32 : i32, i32, i32
  }
  func.func @transform_1(%arg0: i32, %arg1: i32) -> (i32, i32) {
    %c0_i32 = arith.constant 0 : i32
    %c0_i32_0 = arith.constant 0 : i32
    %c0_i32_1 = arith.constant 0 : i32
    return %c0_i32, %c0_i32_0 : i32, i32
  }
  func.func @transform_2(%arg0: i32, %arg1: i32) -> (i32, i32) {
    %c0_i32 = arith.constant 0 : i32
    %c0_i32_0 = arith.constant 0 : i32
    %c0_i32_1 = arith.constant 0 : i32
    return %c0_i32, %c0_i32_0 : i32, i32
  }
  func.func @transform_3(%arg0: i32, %arg1: i32) -> (i32, i32) {
    %c0_i32 = arith.constant 0 : i32
    %c0_i32_0 = arith.constant 0 : i32
    %c0_i32_1 = arith.constant 0 : i32
    return %c0_i32, %c0_i32_0 : i32, i32
  }
  func.func @transform_4(%arg0: i32, %arg1: i32) -> (i32, i32) {
    %c0_i32 = arith.constant 0 : i32
    %c0_i32_0 = arith.constant 0 : i32
    %c0_i32_1 = arith.constant 0 : i32
    return %c0_i32, %c0_i32_0 : i32, i32
  }
  func.func @transform_5(%arg0: i32, %arg1: i32) -> (i32, i32, i32) {
    %c0_i32 = arith.constant 0 : i32
    %c0_i32_0 = arith.constant 0 : i32
    return %arg0, %arg1, %c0_i32 : i32, i32, i32
  }
  func.func @transform_6(%arg0: i32, %arg1: i32) -> (i32, i32, i32) {
    %c0_i32 = arith.constant 0 : i32
    %c0_i32_0 = arith.constant 0 : i32
    return %arg0, %arg1, %c0_i32 : i32, i32, i32
  }
}

module attributes {stable_mosaic.version = 11 : i64} {
  func.func @_kv_project_kernel(%arg0: i32, %arg1: i32, %arg2: memref<1x128x256xbf16, #tpu.memory_space<vmem>>, %arg3: memref<256x256xbf16, #tpu.memory_space<vmem>>, %arg4: memref<1x256xf32, #tpu.memory_space<vmem>>, %arg5: memref<256x256xbf16, #tpu.memory_space<vmem>>, %arg6: memref<1x256xf32, #tpu.memory_space<vmem>>, %arg7: memref<1x128x256xbf16, #tpu.memory_space<vmem>>, %arg8: memref<1x128x256xbf16, #tpu.memory_space<vmem>>) attributes {dimension_semantics = [#tpu.dimension_semantics<parallel>, #tpu.dimension_semantics<parallel>], iteration_bounds = array<i64: 2, 1>, scalar_prefetch = 0 : i64, scratch_operands = 0 : i64, tpu.core_type = #tpu.core_type<tc>, window_params = [{transform_indices = @transform_0, window_bounds = array<i64: 1, 128, 256>}, {pipeline_mode = #tpu.pipeline_mode<synchronous>, transform_indices = @transform_1, window_bounds = array<i64: 256, 256>}, {pipeline_mode = #tpu.pipeline_mode<synchronous>, transform_indices = @transform_2, window_bounds = array<i64: 1, 256>}, {pipeline_mode = #tpu.pipeline_mode<synchronous>, transform_indices = @transform_3, window_bounds = array<i64: 256, 256>}, {pipeline_mode = #tpu.pipeline_mode<synchronous>, transform_indices = @transform_4, window_bounds = array<i64: 1, 256>}, {transform_indices = @transform_5, window_bounds = array<i64: 1, 128, 256>}, {transform_indices = @transform_6, window_bounds = array<i64: 1, 128, 256>}]} {
    %c0 = arith.constant 0 : index
    %c0_0 = arith.constant 0 : index
    %c0_1 = arith.constant 0 : index
    %0 = vector.load %arg2[%c0, %c0_0, %c0_1] : memref<1x128x256xbf16, #tpu.memory_space<vmem>>, vector<1x128x256xbf16>
    %1 = vector.shape_cast %0 : vector<1x128x256xbf16> to vector<128x256xbf16>
    %c0_2 = arith.constant 0 : index
    %c0_3 = arith.constant 0 : index
    %2 = vector.load %arg3[%c0_2, %c0_3] : memref<256x256xbf16, #tpu.memory_space<vmem>>, vector<256x256xbf16>
    %cst = arith.constant dense<0.000000e+00> : vector<128x256xf32>
    %3 = tpu.matmul %1, %2, %cst {dimension_numbers = #tpu.dot_dimension_numbers<[1], [0], [0], [1], [0, 0, 1, 1], [], []>} : vector<128x256xbf16>, vector<256x256xbf16>, vector<128x256xf32> -> vector<128x256xf32>
    %c0_4 = arith.constant 0 : index
    %c0_5 = arith.constant 0 : index
    %4 = vector.load %arg4[%c0_4, %c0_5] : memref<1x256xf32, #tpu.memory_space<vmem>>, vector<1x256xf32>
    %5 = vector.broadcast %4 : vector<1x256xf32> to vector<128x256xf32>
    %6 = arith.addf %3, %5 : vector<128x256xf32>
    %c0_6 = arith.constant 0 : index
    %c0_7 = arith.constant 0 : index
    %7 = vector.load %arg5[%c0_6, %c0_7] : memref<256x256xbf16, #tpu.memory_space<vmem>>, vector<256x256xbf16>
    %cst_8 = arith.constant dense<0.000000e+00> : vector<128x256xf32>
    %8 = tpu.matmul %1, %7, %cst_8 {dimension_numbers = #tpu.dot_dimension_numbers<[1], [0], [0], [1], [0, 0, 1, 1], [], []>} : vector<128x256xbf16>, vector<256x256xbf16>, vector<128x256xf32> -> vector<128x256xf32>
    %c0_9 = arith.constant 0 : index
    %c0_10 = arith.constant 0 : index
    %9 = vector.load %arg6[%c0_9, %c0_10] : memref<1x256xf32, #tpu.memory_space<vmem>>, vector<1x256xf32>
    %10 = vector.broadcast %9 : vector<1x256xf32> to vector<128x256xf32>
    %11 = arith.addf %8, %10 : vector<128x256xf32>
    %12 = arith.truncf %6 : vector<128x256xf32> to vector<128x256xbf16>
    %c0_11 = arith.constant 0 : index
    %c0_12 = arith.constant 0 : index
    %c0_13 = arith.constant 0 : index
    %13 = vector.load %arg7[%c0_11, %c0_12, %c0_13] : memref<1x128x256xbf16, #tpu.memory_space<vmem>>, vector<1x128x256xbf16>
    %14 = vector.shape_cast %13 : vector<1x128x256xbf16> to vector<128x256xbf16>
    %15 = vector.shape_cast %12 : vector<128x256xbf16> to vector<1x128x256xbf16>
    tpu.vector_store %arg7[%c0_11, %c0_12, %c0_13], %15 {strides = array<i32>} : memref<1x128x256xbf16, #tpu.memory_space<vmem>>, vector<1x128x256xbf16>,
    %16 = arith.truncf %11 : vector<128x256xf32> to vector<128x256xbf16>
    %c0_14 = arith.constant 0 : index
    %c0_15 = arith.constant 0 : index
    %c0_16 = arith.constant 0 : index
    %17 = vector.load %arg8[%c0_14, %c0_15, %c0_16] : memref<1x128x256xbf16, #tpu.memory_space<vmem>>, vector<1x128x256xbf16>
    %18 = vector.shape_cast %17 : vector<1x128x256xbf16> to vector<128x256xbf16>
    %19 = vector.shape_cast %16 : vector<128x256xbf16> to vector<1x128x256xbf16>
    tpu.vector_store %arg8[%c0_14, %c0_15, %c0_16], %19 {strides = array<i32>} : memref<1x128x256xbf16, #tpu.memory_space<vmem>>, vector<1x128x256xbf16>,
    return
  }
  func.func @transform_0(%arg0: i32, %arg1: i32) -> (i32, i32, i32) {
    %c0_i32 = arith.constant 0 : i32
    %c0_i32_0 = arith.constant 0 : i32
    return %arg0, %arg1, %c0_i32 : i32, i32, i32
  }
  func.func @transform_1(%arg0: i32, %arg1: i32) -> (i32, i32) {
    %c0_i32 = arith.constant 0 : i32
    %c0_i32_0 = arith.constant 0 : i32
    %c0_i32_1 = arith.constant 0 : i32
    return %c0_i32, %c0_i32_0 : i32, i32
  }
  func.func @transform_2(%arg0: i32, %arg1: i32) -> (i32, i32) {
    %c0_i32 = arith.constant 0 : i32
    %c0_i32_0 = arith.constant 0 : i32
    %c0_i32_1 = arith.constant 0 : i32
    return %c0_i32, %c0_i32_0 : i32, i32
  }
  func.func @transform_3(%arg0: i32, %arg1: i32) -> (i32, i32) {
    %c0_i32 = arith.constant 0 : i32
    %c0_i32_0 = arith.constant 0 : i32
    %c0_i32_1 = arith.constant 0 : i32
    return %c0_i32, %c0_i32_0 : i32, i32
  }
  func.func @transform_4(%arg0: i32, %arg1: i32) -> (i32, i32) {
    %c0_i32 = arith.constant 0 : i32
    %c0_i32_0 = arith.constant 0 : i32
    %c0_i32_1 = arith.constant 0 : i32
    return %c0_i32, %c0_i32_0 : i32, i32
  }
  func.func @transform_5(%arg0: i32, %arg1: i32) -> (i32, i32, i32) {
    %c0_i32 = arith.constant 0 : i32
    %c0_i32_0 = arith.constant 0 : i32
    return %arg0, %arg1, %c0_i32 : i32, i32, i32
  }
  func.func @transform_6(%arg0: i32, %arg1: i32) -> (i32, i32, i32) {
    %c0_i32 = arith.constant 0 : i32
    %c0_i32_0 = arith.constant 0 : i32
    return %arg0, %arg1, %c0_i32 : i32, i32, i32
  }
}

</mosaic_0001>

<bundles_post_ra>
// kernel: tpu_custom_call.1
= control target key start
LH: loop header
LB: loop body
LE: loop exit
PB: predicated region body
PF: predicated region fallthrough
CT: control target
= control target key end

     0   :  { %s2709_s0 = inlined_call_operand.hbm [shape: bf16[2,128,256], index: 0, kind: input, shape index: {}]   ;;  %s2710_s1 = inlined_call_operand.hbm [shape: bf16[256,256], index: 1, kind: input, shape index: {}]   ;;  %s2711_s2 = inlined_call_operand.hbm [shape: f32[1,256], index: 2, kind: input, shape index: {}]   ;;  %s2712_s3 = inlined_call_operand.hbm [shape: bf16[256,256], index: 3, kind: input, shape index: {}]   ;;  %s2713_s4 = inlined_call_operand.hbm [shape: f32[1,256], index: 4, kind: input, shape index: {}]   ;;  %s2714_s5 = inlined_call_operand.hbm [shape: bf16[2,128,256], index: 5, kind: output, shape index: {0}]   ;;  %s2715_s6 = inlined_call_operand.hbm [shape: bf16[2,128,256], index: 6, kind: output, shape index: {1}]  }
   0x1   :  { %2723 = sst [smem:[#allocation21_spill]] %s2715_s6 }
   0x2   :  { %12 = vsyncpa [#allocation3], 0 }
   0x3   :  { %14 = vsyncpa [#allocation3 + $0x1], 0 }
   0x4   :  { %15 = vsyncpa [#allocation6], 0 }
   0x5   :  { %16 = vsyncpa [#allocation9], 0 }
   0x6   :  { %17 = vsyncpa [#allocation4], 0 }
   0x7   :  { %19 = vsyncpa [#allocation4 + $0x1], 0 }
   0x8   :  { %20 = vsyncpa [#allocation13], 0 }
   0x9   :  { %22 = vsyncpa [#allocation13 + $0x1], 0  ;;  %s2232_s21 = smov 0   ;;  %s2234_s22 = smov 0  }
   0xa   :  { %s2236_s23 = smov 0   ;;  %s2238_s24 = smov 0  }
   0xb   :  { %s2240_s25 = smov 0   ;;  %s2242_s26 = smov 0  }
   0xc LB: > { %2724 = sst [smem:[#allocation19_spill]] %s2164_s21  ;;  %s1514_s27 = sadd.s32 4294967295, %s2184_s26   ;;  %s2184_s26 = sphi %s2242_s26, %s28_s26   ;;  %s2180_s25 = sphi %s2240_s25, %s2748_s25   ;;  %s2176_s24 = sphi %s2238_s24, %s2747_s24   ;;  %s2172_s23 = sphi %s2236_s23, %s2746_s23   ;;  %s2168_s22 = sphi %s2234_s22, %s2745_s22   ;;  %s2164_s21 = sphi %s2232_s21, %s2744_s21  }
   0xd   : > { %s1515_s28 = sadd.s32 4294967294, %s2184_s26   ;;  %p62_p0 = scmp.ne.s32.totalorder %s2168_s22, %s2164_s21 }
   0xe   : > { %p2266_p1 = scmp.eq.s32.totalorder %s1514_s27, 0  ;;  %p2270_p2 = scmp.eq.s32.totalorder %s1514_s27, 1 }
   0xf   : > { %p178_p3 = scmp.eq.s32.totalorder %s1515_s28, 1  ;;  %p1516_p5 = scmp.ge.s32.totalorder %s2184_s26, 1 }
  0x10   : > { %s2725_s29 = scalar_select %p2266_p1, 1, 0 }
  0x11   : > { %s2726_s30 = scalar_select %p2270_p2, 1, 0 }
  0x12   : > { %p2276_p4 = por %p2266_p1, %p62_p0  ;;  %p2281_p6 = por %p178_p3, %p62_p0 }
  0x13   : > { %p213_p7 = scmp.lt.s32.totalorder %s2184_s26, 3  ;;  %s2186_s10 = smov [#allocation5]  }
  0x14   : > { %s2727_s7 = scalar_select %p2276_p4, 1, 0 }
  0x15   : > { %s2728_s8 = scalar_select %p2281_p6, 1, 0 }
  0x16   : > { %p2286_p8 = pnand %p1516_p5, %p213_p7  ;;  %s225_s11 = sshll.u32 %s2186_s10, 4  ;;  %s2290_s11 = int_to_ptr.vmem [resolvable:$true] %s225_s11 }
  0x17   : > { %2729 = sst [smem:[#allocation20_spill]] %s2728_s8  ;;  %s2187_s13 = smov [#allocation8]  }
  0x18   : > { %s2730_s9 = scalar_select %p2286_p8, 1, 0 }
  0x19   : > { %p1710_p9 = pneg %p2286_p8  ;;  %s249_s14 = sshll.u32 %s2187_s13, 4  ;;  %s2301_s14 = int_to_ptr.vmem [resolvable:$true] %s249_s14 }
  0x1a   : > { %s2188_s15 = smov [#allocation7]   ;;  %s1920_s19 = scalar_lea.hbm %s2710_s1, 4096 }
  0x1b   : > { %p2297_p11 = pnand %p1710_p9, %p2266_p1  ;;  %s2303_s16 = sshll.u32 %s2188_s15, 4  ;;  %s240_s16 = int_to_ptr.vmem [resolvable:$true] %s2303_s16 }
  0x1c   : > { %p1921_p12 = scmp.ne.s32.totalorder %s2710_s1, %s1920_s19  ;;  %p1927_p5 = scmp.lt.u32.totalorder %s1920_s19, %s2710_s1 }
  0x1d   : > { %p2313_p13 = pneg %p2297_p11 }
  0x1f   : > { %p1923_p0 = pnand %p2313_p13, %p1921_p12 }
  0x21   : > { %p1924_p3 = pneg %p1923_p0 }
  0x23   : > { %p1929_p7 = pnand %p1927_p5, %p1924_p3 }
  0x25   : > { %1932 = shalt.err (!%p1929_p7)
}
  0x26   : > { %s1933_s15 = scalar_lea.vmem %s2290_s11, 4096  ;;  %p1941_p1 = scmp.lt.s32.totalorder %s2290_s11, %s2290_s11 }
  0x27   : > { %p1934_p9 = scmp.ne.s32.totalorder %s2290_s11, %s1933_s15  ;;  %p1942_p4 = scmp.lt.s32.totalorder %s1933_s15, %s1933_s15 }
  0x29   : > { %p1936_p10 = pnand %p1934_p9, %p2313_p13  ;;  %p1943_p12 = por %p1942_p4, %p1941_p1 }
  0x2b   : > { %p1937_p6 = pneg %p1936_p10 }
  0x2d   : > { %p1944_p0 = pnand %p1943_p12, %p1937_p6 }
  0x2f   : > { %1947 = shalt.err (!%p1944_p0)
}
  0x30   : > { %s2189_s17 = smov 128   ;;  %s2190_s18 = smov 8  }
  0x31   : > { %1713 = dma.hbm_to_vmem [thread:$0]  (!%p2297_p11), %s2710_s1, 4096, %s2290_s11, [#allocation6], %s2189_s17, %s2189_s17, %s2190_s18  }
  0x32   : > { %s1948_s13 = scalar_lea.hbm %s2712_s3, 4096 }
  0x33   : > { %p1949_p1 = scmp.ne.s32.totalorder %s2712_s3, %s1948_s13  ;;  %p1955_p10 = scmp.lt.u32.totalorder %s1948_s13, %s2712_s3 }
  0x35   : > { %p1951_p4 = pnand %p1949_p1, %p2313_p13 }
  0x37   : > { %p1952_p6 = pneg %p1951_p4 }
  0x39   : > { %p1957_p3 = pnand %p1955_p10, %p1952_p6 }
  0x3b   : > { %1960 = shalt.err (!%p1957_p3)
}
  0x3c   : > { %s1961_s11 = scalar_lea.vmem %s2301_s14, 4096  ;;  %p1969_p12 = scmp.lt.s32.totalorder %s2301_s14, %s2301_s14 }
  0x3d   : > { %p1962_p5 = scmp.ne.s32.totalorder %s2301_s14, %s1961_s11  ;;  %p1970_p0 = scmp.lt.s32.totalorder %s1961_s11, %s1961_s11 }
  0x3f   : > { %p1964_p7 = pnand %p1962_p5, %p2313_p13  ;;  %p1971_p1 = por %p1970_p0, %p1969_p12 }
  0x41   : > { %p1965_p9 = pneg %p1964_p7 }
  0x43   : > { %p1972_p4 = pnand %p1971_p1, %p1965_p9 }
  0x45   : > { %1975 = shalt.err (!%p1972_p4)
}
  0x46   : > { %1719 = dma.hbm_to_vmem [thread:$0]  (!%p2297_p11), %s2712_s3, 4096, %s2301_s14, [#allocation9], %s2189_s17, %s2189_s17, %s2190_s18  }
  0x47   : > { %s1976_s20 = scalar_lea.hbm %s2711_s2, 32 }
  0x48   : > { %p1977_p6 = scmp.ne.s32.totalorder %s2711_s2, %s1976_s20  ;;  %p1983_p5 = scmp.lt.u32.totalorder %s1976_s20, %s2711_s2 }
  0x4a   : > { %p1979_p10 = pnand %p1977_p6, %p2313_p13 }
  0x4c   : > { %p1980_p3 = pneg %p1979_p10 }
  0x4e   : > { %p1985_p7 = pnand %p1983_p5, %p1980_p3 }
  0x50   : > { %1988 = shalt.err (!%p1985_p7)
}
  0x51   : > { %s1989_s11 = scalar_lea.vmem %s240_s16, 32  ;;  %p1997_p1 = scmp.lt.s32.totalorder %s240_s16, %s240_s16 }
  0x52   : > { %p1990_p9 = scmp.ne.s32.totalorder %s240_s16, %s1989_s11  ;;  %p1998_p4 = scmp.lt.s32.totalorder %s1989_s11, %s1989_s11 }
  0x54   : > { %p1992_p12 = pnand %p1990_p9, %p2313_p13  ;;  %p1999_p8 = por %p1998_p4, %p1997_p1 }
  0x56   : > { %p1993_p0 = pneg %p1992_p12 }
  0x58   : > { %p2000_p2 = pnand %p1999_p8, %p1993_p0 }
  0x5a   : > { %2003 = shalt.err (!%p2000_p2)
}
  0x5b   : > { %1716 = dma.hbm_to_vmem [thread:$0]  (!%p2297_p11), %s2711_s2, 32, %s240_s16, [#allocation6]  }
  0x5c   : > { %s2191_s21 = smov [#allocation10]   ;;  %s2004_s27 = scalar_lea.hbm %s2713_s4, 32 }
  0x5d   : > { %s263_s8 = sshll.u32 %s2191_s21, 4  ;;  %p2005_p6 = scmp.ne.s32.totalorder %s2713_s4, %s2004_s27  ;;  %s264_s8 = int_to_ptr.vmem [resolvable:$true] %s263_s8 }
  0x5e   : > { %p2011_p10 = scmp.lt.u32.totalorder %s2004_s27, %s2713_s4 }
  0x5f   : > { %p2007_p2 = pnand %p2005_p6, %p2313_p13 }
  0x61   : > { %p2008_p8 = pneg %p2007_p2 }
  0x63   : > { %p2013_p3 = pnand %p2011_p10, %p2008_p8 }
  0x65   : > { %2016 = shalt.err (!%p2013_p3)
}
  0x66   : > { %s2017_s16 = scalar_lea.vmem %s264_s8, 32  ;;  %p2025_p12 = scmp.lt.s32.totalorder %s264_s8, %s264_s8 }
  0x67   : > { %p2018_p5 = scmp.ne.s32.totalorder %s264_s8, %s2017_s16  ;;  %p2026_p0 = scmp.lt.s32.totalorder %s2017_s16, %s2017_s16 }
  0x69   : > { %p2020_p7 = pnand %p2018_p5, %p2313_p13  ;;  %p2027_p1 = por %p2026_p0, %p2025_p12 }
  0x6b   : > { %p2021_p9 = pneg %p2020_p7 }
  0x6d   : > { %p2028_p4 = pnand %p2027_p1, %p2021_p9 }
  0x6f   : > { %2031 = shalt.err (!%p2028_p4)
}
  0x70   : > { %1722 = dma.hbm_to_vmem [thread:$0]  (!%p2297_p11), %s2713_s4, 32, %s264_s8, [#allocation9]  }
  0x71   : > { %s40_s28 = sadd.s32 1, %s2180_s25  ;;  %s49_s21 = sadd.s32 1, %s2172_s23 }
  0x72   : > { %p42_p13 = scmp.ge.s32.totalorder %s40_s28, 2  ;;  %p56_p6 = scmp.ne.s32.totalorder %s2172_s23, %s2168_s22 }
  0x73   : > { %p57_p2 = scmp.eq.s32.totalorder %s2184_s26, 0  ;;  %p1738_p8 = scmp.lt.s32.totalorder %s2184_s26, 2 }
  0x74   : > { %s2750_s28 = smov (%p42_p13, %s40_s28), 0  ;;  %p2733_p3 = scmp.ne.s32.totalorder %s2726_s30, 0 }
  0x75   : > { %p58_p10 = por %p57_p2, %p56_p6  ;;  %s44_s19 = ssub.s32 %s2180_s25, %s2750_s28 }
  0x76   : > { %p2410_p5 = por %p2733_p3, %p56_p6  ;;  %s274_s20 = sand.u32 1, %s2172_s23  }
  0x77   : > { %p47_p7 = scmp.eq.s32.totalorder %s44_s19, 0  ;;  %s1522_s8 = sshll.u32 %s274_s20, 7 }
  0x78   : > { %s1653_s27 = sshll.u32 %s2180_s25, 11  ;;  %s278_s30 = scalar_lea.vmem [#allocation2], %s1522_s8 }
  0x79   : > { %s2419_s10 = scalar_select %p47_p7, %s2172_s23, %s49_s21  }
  0x7a   : > { %s2424_s11 = scalar_lea.hbm %s2709_s0, %s1653_s27  ;;  %s288_s16 = sshll.u32 %s278_s30, 4  ;;  %s2432_s16 = int_to_ptr.vmem [resolvable:$true] %s288_s16 }
  0x7b   : > { %p2428_p11 = pnand %p1738_p8, %p58_p10  ;;  %s2434_s6 = scalar_lea.sflag [#allocation3], %s274_s20 }
  0x7c   : > { %s2032_s21 = scalar_lea.hbm %s2424_s11, 2048  ;;  %s2037_s27 = scalar_lea.hbm %s2709_s0, 4096 }
  0x7d   : > { %p2033_p9 = scmp.ne.s32.totalorder %s2424_s11, %s2032_s21  ;;  %p2034_p12 = pneg %p2428_p11 }
  0x7e   : > { %p2038_p4 = scmp.lt.u32.totalorder %s2424_s11, %s2709_s0  ;;  %p2039_p13 = scmp.lt.u32.totalorder %s2037_s27, %s2032_s21 }
  0x7f   : > { %p2035_p0 = pnand %p2034_p12, %p2033_p9  ;;  %p2041_p2 = scmp.lt.u32.totalorder %s2032_s21, %s2424_s11 }
  0x80   : > { %p2040_p6 = por %p2039_p13, %p2038_p4 }
  0x81   : > { %p2036_p1 = pneg %p2035_p0 }
  0x82   : > { %p2042_p8 = por %p2041_p2, %p2040_p6 }
  0x84   : > { %p2043_p10 = pnand %p2042_p8, %p2036_p1 }
  0x86   : > { %2046 = shalt.err (!%p2043_p10)
}
  0x87   : > { %s2047_s20 = scalar_lea.vmem %s2432_s16, 2048  ;;  %s2192_s30 = smov [#allocation2]  }
  0x88   : > { %p2048_p3 = scmp.ne.s32.totalorder %s2432_s16, %s2047_s20  ;;  %s2052_s19 = sshll.u32 %s2192_s30, 4  ;;  %s2053_s19 = int_to_ptr.vmem [resolvable:$false] %s2052_s19 }
  0x89   : > { %s2054_s8 = scalar_lea.vmem %s2053_s19, 4096  ;;  %p2055_p0 = scmp.lt.s32.totalorder %s2432_s16, %s2053_s19 }
  0x8a   : > { %p2050_p7 = pnand %p2048_p3, %p2034_p12  ;;  %p2056_p4 = scmp.lt.s32.totalorder %s2054_s8, %s2047_s20 }
  0x8c   : > { %p2051_p9 = pneg %p2050_p7  ;;  %p2057_p13 = por %p2056_p4, %p2055_p0 }
  0x8e   : > { %p2058_p6 = pnand %p2057_p13, %p2051_p9 }
  0x90   : > { %2061 = shalt.err (!%p2058_p6)
}
  0x91   : > { %1726 = dma.hbm_to_vmem [thread:$0]  (!%p2428_p11), %s2424_s11, 2048, %s2432_s16, %s2434_s6, %s2189_s17, %s2189_s17, %s2190_s18  }
  0x92   : > { %p2736_p12 = scmp.ne.s32.totalorder %s2730_s9, 0 }
  0x93   : > { %s2468_s21 = sand.u32 (!%p2736_p12), 1, %s2168_s22   ;;  %p2737_p1 = scmp.ne.s32.totalorder (!%p2736_p12), %s2727_s7, 0 }
  0x94   : > { %300 = sbr.rel (%p2736_p12) target bundleno = 540 (0x21c), region = 40  ;;  %s2471_s27 = sshll.u32 (!%p2736_p12), %s2468_s21, 7 }
  0x95   : > { %s303_s14 = scalar_lea.sflag (!%p2736_p12), [#allocation3], %s2468_s21  ;;  %s2475_s13 = scalar_lea.vmem (!%p2736_p12), [#allocation2], %s2471_s27 }
  0x9b   : > { %2143 = dma.done.wait (%p2737_p1), %s303_s14, 2048  }
  0x9c   : > { %2145 = vsyncadd (%p2737_p1), %s303_s14, 4294965248  ;;  %p2738_p11 = scmp.ne.s32.totalorder %s2725_s29, 0 }
  0x9e   : > { %2147 = dma.done.wait (%p2738_p11), [#allocation6], 4128  }
  0x9f   : > { %2149 = vsyncadd (%p2738_p11), [#allocation6], 4294963168 }
  0xa0   : > { %2151 = dma.done.wait (%p2738_p11), [#allocation9], 4128  }
  0xa1   : > { %2153 = vsyncadd (%p2738_p11), [#allocation9], 4294963168  ;;  %v1800_v0 = vld [vmem:[#allocation5 + $0x4] ss:$8 sps:$4 sm:$0xff]   ;;  %v1804_v2 = vld [vmem:[#allocation5] ss:$8 sps:$4 sm:$0xff]  }
  0xa2   : > { %v1802_v1 = vld [vmem:[#allocation8 + $0x4] ss:$8 sps:$4 sm:$0xff]   ;;  %659 = vmatprep.subr.bf16.mxu0 %v1800_v0  ;;  %v1805_v3 = vld [vmem:[#allocation8] ss:$8 sps:$4 sm:$0xff]   ;;  %v1806_v4 = vld [vmem:[#allocation5 + $0x14] ss:$8 sps:$4 sm:$0xff]  }
  0xa3   : > { %976 = vmatprep.subr.bf16.mxu1 %v1802_v1  ;;  %660 = vmatpush1.bf16.msra.mxu0 %v1804_v2  ;;  %v1808_v5 = vld [vmem:[#allocation8 + $0x14] ss:$8 sps:$4 sm:$0xff]   ;;  %v1811_v7 = vld [vmem:[#allocation8 + $0x10] ss:$8 sps:$4 sm:$0xff]   ;;  %v1812_v8 = vld [vmem:[#allocation5 + $0x24] ss:$8 sps:$4 sm:$0xff]  }
  0xa4   : > { %977 = vmatpush1.bf16.msra.mxu1 %v1805_v3  ;;  %v1810_v6 = vld [vmem:[#allocation5 + $0x10] ss:$8 sps:$4 sm:$0xff]   ;;  %661 = vmatprep.subr.bf16.mxu0 %v1806_v4  ;;  %v1816_v10 = vld [vmem:[#allocation5 + $0x20] ss:$8 sps:$4 sm:$0xff]   ;;  %v1818_v12 = vld [vmem:[#allocation5 + $0x34] ss:$8 sps:$4 sm:$0xff]  }
  0xa5   : > { %978 = vmatprep.subr.bf16.mxu1 %v1808_v5  ;;  %v1814_v9 = vld [vmem:[#allocation8 + $0x24] ss:$8 sps:$4 sm:$0xff]   ;;  %v1817_v11 = vld [vmem:[#allocation8 + $0x20] ss:$8 sps:$4 sm:$0xff]   ;;  %v1820_v13 = vld [vmem:[#allocation8 + $0x34] ss:$8 sps:$4 sm:$0xff]  }
  0xa6   : > { %v1822_v14 = vld [vmem:[#allocation5 + $0x30] ss:$8 sps:$4 sm:$0xff]   ;;  %v1824_v16 = vld [vmem:[#allocation5 + $0x44] ss:$8 sps:$4 sm:$0xff]   ;;  %v1828_v18 = vld [vmem:[#allocation5 + $0x40] ss:$8 sps:$4 sm:$0xff]  }
  0xa7   : > { %662 = vmatpush1.bf16.msra.mxu0 %v1810_v6  ;;  %v1823_v15 = vld [vmem:[#allocation8 + $0x30] ss:$8 sps:$4 sm:$0xff]   ;;  %v1826_v17 = vld [vmem:[#allocation8 + $0x44] ss:$8 sps:$4 sm:$0xff]   ;;  %v1829_v19 = vld [vmem:[#allocation8 + $0x40] ss:$8 sps:$4 sm:$0xff]  }
  0xa8   : > { %979 = vmatpush1.bf16.msra.mxu1 %v1811_v7  ;;  %663 = vmatprep.subr.bf16.mxu0 %v1812_v8  ;;  %v1830_v20 = vld [vmem:[#allocation5 + $0x54] ss:$8 sps:$4 sm:$0xff]   ;;  %v1834_v22 = vld [vmem:[#allocation5 + $0x50] ss:$8 sps:$4 sm:$0xff]   ;;  %v1836_v24 = vld [vmem:[#allocation5 + $0x64] ss:$8 sps:$4 sm:$0xff]  }
  0xa9   : > { %980 = vmatprep.subr.bf16.mxu1 %v1814_v9  ;;  %v1832_v21 = vld [vmem:[#allocation8 + $0x54] ss:$8 sps:$4 sm:$0xff]   ;;  %v1835_v23 = vld [vmem:[#allocation8 + $0x50] ss:$8 sps:$4 sm:$0xff]   ;;  %v1838_v25 = vld [vmem:[#allocation8 + $0x64] ss:$8 sps:$4 sm:$0xff]  }
  0xaa   : > { %v1840_v26 = vld [vmem:[#allocation5 + $0x60] ss:$8 sps:$4 sm:$0xff]   ;;  %v1842_v28 = vld [vmem:[#allocation5 + $0x74] ss:$8 sps:$4 sm:$0xff]   ;;  %v1846_v30 = vld [vmem:[#allocation5 + $0x70] ss:$8 sps:$4 sm:$0xff]  }
  0xab   : > { %664 = vmatpush1.bf16.msra.mxu0 %v1816_v10  ;;  %v1841_v27 = vld [vmem:[#allocation8 + $0x60] ss:$8 sps:$4 sm:$0xff]   ;;  %v1844_v29 = vld [vmem:[#allocation8 + $0x74] ss:$8 sps:$4 sm:$0xff]   ;;  %v1847_v31 = vld [vmem:[#allocation8 + $0x70] ss:$8 sps:$4 sm:$0xff]  }
  0xac   : > { %981 = vmatpush1.bf16.msra.mxu1 %v1817_v11  ;;  %665 = vmatprep.subr.bf16.mxu0 %v1818_v12  ;;  %v1848_v32 = vld [vmem:[#allocation5 + $0x84] ss:$8 sps:$4 sm:$0xff]   ;;  %v1852_v34 = vld [vmem:[#allocation5 + $0x80] ss:$8 sps:$4 sm:$0xff]   ;;  %v1854_v36 = vld [vmem:[#allocation5 + $0x94] ss:$8 sps:$4 sm:$0xff]  }
  0xad   : > { %982 = vmatprep.subr.bf16.mxu1 %v1820_v13  ;;  %v1850_v33 = vld [vmem:[#allocation8 + $0x84] ss:$8 sps:$4 sm:$0xff]   ;;  %v1853_v35 = vld [vmem:[#allocation8 + $0x80] ss:$8 sps:$4 sm:$0xff]   ;;  %v1856_v37 = vld [vmem:[#allocation8 + $0x94] ss:$8 sps:$4 sm:$0xff]  }
  0xae   : > { %v1858_v38 = vld [vmem:[#allocation5 + $0x90] ss:$8 sps:$4 sm:$0xff]   ;;  %v1860_v40 = vld [vmem:[#allocation5 + $0xa4] ss:$8 sps:$4 sm:$0xff]   ;;  %v1864_v42 = vld [vmem:[#allocation5 + $0xa0] ss:$8 sps:$4 sm:$0xff]  }
  0xaf   : > { %666 = vmatpush1.bf16.msra.mxu0 %v1822_v14  ;;  %v1859_v39 = vld [vmem:[#allocation8 + $0x90] ss:$8 sps:$4 sm:$0xff]   ;;  %v1862_v41 = vld [vmem:[#allocation8 + $0xa4] ss:$8 sps:$4 sm:$0xff]   ;;  %v1865_v43 = vld [vmem:[#allocation8 + $0xa0] ss:$8 sps:$4 sm:$0xff]  }
  0xb0   : > { %983 = vmatpush1.bf16.msra.mxu1 %v1823_v15  ;;  %667 = vmatprep.subr.bf16.mxu0 %v1824_v16  ;;  %v1866_v44 = vld [vmem:[#allocation5 + $0xb4] ss:$8 sps:$4 sm:$0xff]   ;;  %v1870_v46 = vld [vmem:[#allocation5 + $0xb0] ss:$8 sps:$4 sm:$0xff]   ;;  %v1898_v48 = vld [vmem:[%s2475_s13 + $0x4] ss:$8 sps:$4 sm:$0xff]   ;;  %v409_v16 = vlaneseq }
  0xb1   : > { %984 = vmatprep.subr.bf16.mxu1 %v1826_v17  ;;  %v1868_v45 = vld [vmem:[#allocation8 + $0xb4] ss:$8 sps:$4 sm:$0xff]   ;;  %v1871_v47 = vld [vmem:[#allocation8 + $0xb0] ss:$8 sps:$4 sm:$0xff]   ;;  %v1872_v49 = vld [vmem:[#allocation5 + $0xc4] ss:$8 sps:$4 sm:$0xff]   ;;  %691 = vmatprep.mubr.bf16.mxu0 %v1898_v48 }
  0xb2   : > { %v1874_v50 = vld [vmem:[#allocation8 + $0xc4] ss:$8 sps:$4 sm:$0xff]   ;;  %1008 = vmatprep.mubr.bf16.mxu1 %v1898_v48  ;;  %v1877_v52 = vld [vmem:[#allocation8 + $0xc0] ss:$8 sps:$4 sm:$0xff]   ;;  %v1878_v53 = vld [vmem:[#allocation5 + $0xd4] ss:$8 sps:$4 sm:$0xff]  }
  0xb3   : > { %668 = vmatpush1.bf16.msra.mxu0 %v1828_v18  ;;  %v1876_v51 = vld [vmem:[#allocation5 + $0xc0] ss:$8 sps:$4 sm:$0xff]   ;;  %v1882_v55 = vld [vmem:[#allocation5 + $0xd0] ss:$8 sps:$4 sm:$0xff]   ;;  %v1884_v57 = vld [vmem:[#allocation5 + $0xe4] ss:$8 sps:$4 sm:$0xff]  }
  0xb4   : > { %985 = vmatpush1.bf16.msra.mxu1 %v1829_v19  ;;  %669 = vmatprep.subr.bf16.mxu0 %v1830_v20  ;;  %v1880_v54 = vld [vmem:[#allocation8 + $0xd4] ss:$8 sps:$4 sm:$0xff]   ;;  %v1883_v56 = vld [vmem:[#allocation8 + $0xd0] ss:$8 sps:$4 sm:$0xff]   ;;  %v1886_v58 = vld [vmem:[#allocation8 + $0xe4] ss:$8 sps:$4 sm:$0xff]  }
  0xb5   : > { %986 = vmatprep.subr.bf16.mxu1 %v1832_v21  ;;  %v1888_v59 = vld [vmem:[#allocation5 + $0xe0] ss:$8 sps:$4 sm:$0xff]   ;;  %v1890_v61 = vld [vmem:[#allocation5 + $0xf4] ss:$8 sps:$4 sm:$0xff]   ;;  %v1894_v63 = vld [vmem:[#allocation5 + $0xf0] ss:$8 sps:$4 sm:$0xff]  }
  0xb6   : > { %v1889_v60 = vld [vmem:[#allocation8 + $0xe0] ss:$8 sps:$4 sm:$0xff]   ;;  %v1892_v62 = vld [vmem:[#allocation8 + $0xf4] ss:$8 sps:$4 sm:$0xff]   ;;  %v1895_v0 = vld [vmem:[#allocation8 + $0xf0] ss:$8 sps:$4 sm:$0xff]  }
  0xb7   : > { %670 = vmatpush1.bf16.msra.mxu0 %v1834_v22  ;;  %v1896_v1 = vld [vmem:[%s2475_s13] ss:$8 sps:$4 sm:$0xff]   ;;  %v1899_v2 = vld [vmem:[%s2475_s13 + $0x14] ss:$8 sps:$4 sm:$0xff]   ;;  %v1901_v3 = vld [vmem:[%s2475_s13 + $0x10] ss:$8 sps:$4 sm:$0xff]  }
  0xb8   : > { %987 = vmatpush1.bf16.msra.mxu1 %v1835_v23  ;;  %671 = vmatprep.subr.bf16.mxu0 %v1836_v24  ;;  %v1902_v4 = vld [vmem:[%s2475_s13 + $0x24] ss:$8 sps:$4 sm:$0xff]   ;;  %v1904_v5 = vld [vmem:[%s2475_s13 + $0x20] ss:$8 sps:$4 sm:$0xff]   ;;  %v1905_v6 = vld [vmem:[%s2475_s13 + $0x34] ss:$8 sps:$4 sm:$0xff]  }
  0xb9   : > { %988 = vmatprep.subr.bf16.mxu1 %v1838_v25  ;;  %v1907_v7 = vld [vmem:[%s2475_s13 + $0x30] ss:$8 sps:$4 sm:$0xff]   ;;  %v1908_v8 = vld [vmem:[%s2475_s13 + $0x44] ss:$8 sps:$4 sm:$0xff]   ;;  %v1910_v9 = vld [vmem:[%s2475_s13 + $0x40] ss:$8 sps:$4 sm:$0xff]  }
  0xba   : > { %v1911_v10 = vld [vmem:[%s2475_s13 + $0x54] ss:$8 sps:$4 sm:$0xff]   ;;  %v1913_v11 = vld [vmem:[%s2475_s13 + $0x50] ss:$8 sps:$4 sm:$0xff]   ;;  %v1914_v12 = vld [vmem:[%s2475_s13 + $0x64] ss:$8 sps:$4 sm:$0xff]  }
  0xbb   : > { %672 = vmatpush1.bf16.msra.mxu0 %v1840_v26  ;;  %v1916_v13 = vld [vmem:[%s2475_s13 + $0x60] ss:$8 sps:$4 sm:$0xff]   ;;  %v1917_v14 = vld [vmem:[%s2475_s13 + $0x74] ss:$8 sps:$4 sm:$0xff]   ;;  %v1919_v15 = vld [vmem:[%s2475_s13 + $0x70] ss:$8 sps:$4 sm:$0xff]  }
  0xbc   : > { %989 = vmatpush1.bf16.msra.mxu1 %v1841_v27  ;;  %673 = vmatprep.subr.bf16.mxu0 %v1842_v28  ;;  %v410_v17 = vshrl.u32 %v409_v16, 7  ;;  %v407_v19 = vld [vmem:[#allocation7] sm:$0x3]  ;;  %v804_v20 = vld [vmem:[#allocation10] sm:$0x3]  ;;  %s2522_s29 = scalar_lea.vmem [#allocation11], %s2471_s27 }
  0xbd   : > { %990 = vmatprep.subr.bf16.mxu1 %v1844_v29  ;;  %s2526_s7 = scalar_lea.vmem [#allocation12], %s2471_s27  ;;  %s1686_s9 = sshll.u32 %s2176_s24, 11 }
  0xbe   : > { %v411_v18 = vsub.s32 0, %v410_v17  ;;  %v415_v21 = vsub.s32 1, %v410_v17  ;;  %s1335_s17 = sshll.u32 %s2522_s29, 4  ;;  %s2616_s11 = scalar_lea.hbm %s2714_s5, %s1686_s9  ;;  %s2619_s17 = int_to_ptr.vmem [resolvable:$true] %s1335_s17 }
  0xbf   : > { %674 = vmatpush1.bf16.msra.mxu0 %v1846_v30  ;;  %s1354_s16 = sshll.u32 %s2526_s7, 4  ;;  %s2739_s20 = sld [smem:[#allocation21_spill]]  ;;  %s2628_s16 = int_to_ptr.vmem [resolvable:$true] %s1354_s16 }
  0xc0   : > { %991 = vmatpush1.bf16.msra.mxu1 %v1847_v31  ;;  %675 = vmatprep.subr.bf16.mxu0 %v1848_v32  ;;  %v2505_v22 = vrot.slane %v407_v19, %v411_v18  ;;  %v2507_v23 = vrot.slane %v804_v20, %v411_v18  ;;  %v2509_v24 = vrot.slane %v407_v19, %v415_v21  ;;  %s1314_s19 = scalar_lea.sflag [#allocation4], %s2468_s21  ;;  %s2062_s8 = scalar_lea.vmem %s2619_s17, 2048 }
  0xc1   : > { %992 = vmatprep.subr.bf16.mxu1 %v1850_v33  ;;  %v2511_v25 = vrot.slane %v804_v20, %v415_v21  ;;  %p2063_p2 = scmp.ne.s32.totalorder %s2619_s17, %s2062_s8  ;;  %s2193_s27 = smov [#allocation11]  }
  0xc2   : > { %s2066_s14 = sshll.u32 %s2193_s27, 4  ;;  %s2067_s14 = int_to_ptr.vmem [resolvable:$false] %s2066_s14 }
  0xc3   : > { %676 = vmatpush1.bf16.msra.mxu0 %v1852_v34  ;;  %p2064_p8 = pnand %p2063_p2, %p2410_p5  ;;  %s2068_s13 = scalar_lea.vmem %s2067_s14, 4096 }
  0xc4   : > { %993 = vmatpush1.bf16.msra.mxu1 %v1853_v35  ;;  %677 = vmatprep.subr.bf16.mxu0 %v1854_v36  ;;  %p2069_p3 = scmp.lt.s32.totalorder %s2619_s17, %s2067_s14  ;;  %p2070_p7 = scmp.lt.s32.totalorder %s2068_s13, %s2062_s8 }
  0xc5   : > { %994 = vmatprep.subr.bf16.mxu1 %v1856_v37  ;;  %s2626_s30 = scalar_lea.hbm %s2739_s20, %s1686_s9  ;;  %p2065_p10 = pneg %p2064_p8 }
  0xc6   : > { %p2071_p9 = por %p2070_p7, %p2069_p3 }
  0xc7   : > { %678 = vmatpush1.bf16.msra.mxu0 %v1858_v38 }
  0xc8   : > { %995 = vmatpush1.bf16.msra.mxu1 %v1859_v39  ;;  %679 = vmatprep.subr.bf16.mxu0 %v1860_v40  ;;  %p2072_p0 = pnand %p2071_p9, %p2065_p10 }
  0xc9   : > { %996 = vmatprep.subr.bf16.mxu1 %v1862_v41 }
  0xcb   : > { %680 = vmatpush1.bf16.msra.mxu0 %v1864_v42 }
  0xcc   : > { %997 = vmatpush1.bf16.msra.mxu1 %v1865_v43  ;;  %681 = vmatprep.subr.bf16.mxu0 %v1866_v44 }
  0xcd   : > { %998 = vmatprep.subr.bf16.mxu1 %v1868_v45 }
  0xcf   : > { %682 = vmatpush1.bf16.msra.mxu0 %v1870_v46 }
  0xd0   : > { %999 = vmatpush1.bf16.msra.mxu1 %v1871_v47  ;;  %683 = vmatprep.subr.bf16.mxu0 %v1872_v49 }
  0xd1   : > { %1000 = vmatprep.subr.bf16.mxu1 %v1874_v50 }
  0xd3   : > { %684 = vmatpush1.bf16.msra.mxu0 %v1876_v51 }
  0xd4   : > { %1001 = vmatpush1.bf16.msra.mxu1 %v1877_v52  ;;  %685 = vmatprep.subr.bf16.mxu0 %v1878_v53 }
  0xd5   : > { %1002 = vmatprep.subr.bf16.mxu1 %v1880_v54 }
  0xd7   : > { %686 = vmatpush1.bf16.msra.mxu0 %v1882_v55 }
  0xd8   : > { %1003 = vmatpush1.bf16.msra.mxu1 %v1883_v56  ;;  %687 = vmatprep.subr.bf16.mxu0 %v1884_v57 }
  0xd9   : > { %1004 = vmatprep.subr.bf16.mxu1 %v1886_v58 }
  0xdb   : > { %688 = vmatpush1.bf16.msra.mxu0 %v1888_v59 }
  0xdc   : > { %1005 = vmatpush1.bf16.msra.mxu1 %v1889_v60  ;;  %689 = vmatprep.subr.bf16.mxu0 %v1890_v61 }
  0xdd   : > { %1006 = vmatprep.subr.bf16.mxu1 %v1892_v62 }
  0xdf   : > { %690 = vmatpush1.bf16.msra.mxu0 %v1894_v63 }
  0xe0   : > { %1007 = vmatpush1.bf16.msra.mxu1 %v1895_v0 }
  0xe2   : > { %692 = vmatmul.mubr.bf16.vlgmr.msra.gmra.mrb[0].mxu0 %v1896_v1 }
  0xe3   : > { %1009 = vmatmul.mubr.bf16.vlgmr.msra.gmra.mrb[0].mxu1 %v1896_v1  ;;  %701 = vmatprep.mubr.bf16.mxu0 %v1899_v2 }
  0xe4   : > { %1018 = vmatprep.mubr.bf16.mxu1 %v1899_v2 }
  0xea   : > { %702 = vmatmul.mubr.bf16.gmra.mrb[4].mxu0 %v1901_v3 }
  0xeb   : > { %1019 = vmatmul.mubr.bf16.gmra.mrb[4].mxu1 %v1901_v3  ;;  %711 = vmatprep.mubr.bf16.mxu0 %v1902_v4 }
  0xec   : > { %1028 = vmatprep.mubr.bf16.mxu1 %v1902_v4 }
  0xf2   : > { %712 = vmatmul.mubr.bf16.gmra.mrb[8].mxu0 %v1904_v5 }
  0xf3   : > { %1029 = vmatmul.mubr.bf16.gmra.mrb[8].mxu1 %v1904_v5  ;;  %721 = vmatprep.mubr.bf16.mxu0 %v1905_v6 }
  0xf4   : > { %1038 = vmatprep.mubr.bf16.mxu1 %v1905_v6 }
  0xfa   : > { %722 = vmatmul.mubr.bf16.gmra.mrb[12].mxu0 %v1907_v7 }
  0xfb   : > { %1039 = vmatmul.mubr.bf16.gmra.mrb[12].mxu1 %v1907_v7  ;;  %731 = vmatprep.mubr.bf16.mxu0 %v1908_v8 }
  0xfc   : > { %1048 = vmatprep.mubr.bf16.mxu1 %v1908_v8 }
 0x102   : > { %732 = vmatmul.mubr.bf16.gmra.mrb[16].mxu0 %v1910_v9 }
 0x103   : > { %1049 = vmatmul.mubr.bf16.gmra.mrb[16].mxu1 %v1910_v9  ;;  %741 = vmatprep.mubr.bf16.mxu0 %v1911_v10 }
 0x104   : > { %1058 = vmatprep.mubr.bf16.mxu1 %v1911_v10 }
 0x10a   : > { %742 = vmatmul.mubr.bf16.gmra.mrb[20].mxu0 %v1913_v11 }
 0x10b   : > { %1059 = vmatmul.mubr.bf16.gmra.mrb[20].mxu1 %v1913_v11  ;;  %751 = vmatprep.mubr.bf16.mxu0 %v1914_v12 }
 0x10c   : > { %1068 = vmatprep.mubr.bf16.mxu1 %v1914_v12 }
 0x112   : > { %752 = vmatmul.mubr.bf16.gmra.mrb[24].mxu0 %v1916_v13 }
 0x113   : > { %1069 = vmatmul.mubr.bf16.gmra.mrb[24].mxu1 %v1916_v13  ;;  %761 = vmatprep.mubr.bf16.mxu0 %v1917_v14 }
 0x114   : > { %1078 = vmatprep.mubr.bf16.mxu1 %v1917_v14 }
 0x11a   : > { %762 = vmatmul.mubr.bf16.gmra.mrb[28].mxu0 %v1919_v15 }
 0x11b   : > { %1079 = vmatmul.mubr.bf16.gmra.mrb[28].mxu1 %v1919_v15 }
 0x1b5   : > { %v693_v26 = vpop.f32.mrb[0].mxu0 }
 0x1b6   : > { %v1010_v27 = vpop.f32.mrb[0].mxu1  ;;  %v694_v28 = vadd.f32 %v693_v26, %v2505_v22  ;;  %v695_v30 = vpop.f32.mrb[1].mxu0 }
 0x1b7   : > { %v1011_v29 = vadd.f32 %v1010_v27, %v2507_v23  ;;  %v1012_v31 = vpop.f32.mrb[1].mxu1  ;;  %v696_v32 = vadd.f32 %v695_v30, %v2509_v24  ;;  %v697_v34 = vpop.f32.mrb[2].mxu0 }
 0x1b8   : > { %v1013_v33 = vadd.f32 %v1012_v31, %v2511_v25  ;;  %v1014_v35 = vpop.f32.mrb[2].mxu1  ;;  %v698_v36 = vadd.f32 %v697_v34, %v2505_v22  ;;  %v699_v38 = vpop.f32.mrb[3].mxu0 }
 0x1b9   : > { %v1015_v37 = vadd.f32 %v1014_v35, %v2507_v23  ;;  %v1016_v39 = vpop.f32.mrb[3].mxu1  ;;  %v1654_v40 = vpack.c.bf16 %v696_v32, %v694_v28  ;;  %v700_v42 = vadd.f32 %v699_v38, %v2509_v24 }
 0x1ba   : > { %v1670_v41 = vpack.c.bf16 %v1013_v33, %v1011_v29  ;;  %v1017_v43 = vadd.f32 %v1016_v39, %v2511_v25 }
 0x1bb   : > { %1185 = vst [vmem:[%s2522_s29] sm:$0xff] %v1654_v40  ;;  %v1655_v44 = vpack.c.bf16 %v700_v42, %v698_v36 }
 0x1bc   : > { %1297 = vst [vmem:[%s2526_s7] sm:$0xff] %v1670_v41  ;;  %v1671_v45 = vpack.c.bf16 %v1017_v43, %v1015_v37 }
 0x1bd   : > { %1186 = vst [vmem:[%s2522_s29 + $0x8] sm:$0xff] %v1655_v44  ;;  %v703_v46 = vpop.f32.mrb[4].mxu0 }
 0x1be   : > { %1298 = vst [vmem:[%s2526_s7 + $0x8] sm:$0xff] %v1671_v45  ;;  %v1020_v47 = vpop.f32.mrb[4].mxu1  ;;  %v704_v48 = vadd.f32 %v703_v46, %v2505_v22  ;;  %v705_v50 = vpop.f32.mrb[5].mxu0 }
 0x1bf   : > { %v1021_v49 = vadd.f32 %v1020_v47, %v2507_v23  ;;  %v1022_v51 = vpop.f32.mrb[5].mxu1  ;;  %v706_v52 = vadd.f32 %v705_v50, %v2509_v24  ;;  %v707_v54 = vpop.f32.mrb[6].mxu0 }
 0x1c0   : > { %v1023_v53 = vadd.f32 %v1022_v51, %v2511_v25  ;;  %v1024_v55 = vpop.f32.mrb[6].mxu1  ;;  %v708_v56 = vadd.f32 %v707_v54, %v2505_v22  ;;  %v709_v58 = vpop.f32.mrb[7].mxu0 }
 0x1c1   : > { %v1025_v57 = vadd.f32 %v1024_v55, %v2507_v23  ;;  %v1026_v59 = vpop.f32.mrb[7].mxu1  ;;  %v1656_v60 = vpack.c.bf16 %v706_v52, %v704_v48  ;;  %v710_v62 = vadd.f32 %v709_v58, %v2509_v24 }
 0x1c2   : > { %v1672_v61 = vpack.c.bf16 %v1023_v53, %v1021_v49  ;;  %v1027_v63 = vadd.f32 %v1026_v59, %v2511_v25 }
 0x1c3   : > { %1187 = vst [vmem:[%s2522_s29 + $0x10] sm:$0xff] %v1656_v60  ;;  %v1657_v0 = vpack.c.bf16 %v710_v62, %v708_v56 }
 0x1c4   : > { %1299 = vst [vmem:[%s2526_s7 + $0x10] sm:$0xff] %v1672_v61  ;;  %v1673_v1 = vpack.c.bf16 %v1027_v63, %v1025_v57 }
 0x1c5   : > { %1188 = vst [vmem:[%s2522_s29 + $0x18] sm:$0xff] %v1657_v0  ;;  %v713_v2 = vpop.f32.mrb[8].mxu0 }
 0x1c6   : > { %1300 = vst [vmem:[%s2526_s7 + $0x18] sm:$0xff] %v1673_v1  ;;  %v1030_v3 = vpop.f32.mrb[8].mxu1  ;;  %v714_v4 = vadd.f32 %v713_v2, %v2505_v22  ;;  %v715_v6 = vpop.f32.mrb[9].mxu0 }
 0x1c7   : > { %v1031_v5 = vadd.f32 %v1030_v3, %v2507_v23  ;;  %v1032_v7 = vpop.f32.mrb[9].mxu1  ;;  %v716_v8 = vadd.f32 %v715_v6, %v2509_v24  ;;  %v717_v10 = vpop.f32.mrb[10].mxu0 }
 0x1c8   : > { %v1033_v9 = vadd.f32 %v1032_v7, %v2511_v25  ;;  %v1034_v11 = vpop.f32.mrb[10].mxu1  ;;  %v718_v12 = vadd.f32 %v717_v10, %v2505_v22  ;;  %v719_v14 = vpop.f32.mrb[11].mxu0 }
 0x1c9   : > { %v1035_v13 = vadd.f32 %v1034_v11, %v2507_v23  ;;  %v1036_v15 = vpop.f32.mrb[11].mxu1  ;;  %v1658_v16 = vpack.c.bf16 %v716_v8, %v714_v4  ;;  %v720_v18 = vadd.f32 %v719_v14, %v2509_v24 }
 0x1ca   : > { %v1674_v17 = vpack.c.bf16 %v1033_v9, %v1031_v5  ;;  %v1037_v19 = vadd.f32 %v1036_v15, %v2511_v25 }
 0x1cb   : > { %1189 = vst [vmem:[%s2522_s29 + $0x20] sm:$0xff] %v1658_v16  ;;  %v1659_v20 = vpack.c.bf16 %v720_v18, %v718_v12 }
 0x1cc   : > { %1301 = vst [vmem:[%s2526_s7 + $0x20] sm:$0xff] %v1674_v17  ;;  %v1675_v21 = vpack.c.bf16 %v1037_v19, %v1035_v13 }
 0x1cd   : > { %1190 = vst [vmem:[%s2522_s29 + $0x28] sm:$0xff] %v1659_v20  ;;  %v723_v26 = vpop.f32.mrb[12].mxu0 }
 0x1ce   : > { %1302 = vst [vmem:[%s2526_s7 + $0x28] sm:$0xff] %v1675_v21  ;;  %v1040_v27 = vpop.f32.mrb[12].mxu1  ;;  %v724_v28 = vadd.f32 %v723_v26, %v2505_v22  ;;  %v725_v30 = vpop.f32.mrb[13].mxu0 }
 0x1cf   : > { %v1041_v29 = vadd.f32 %v1040_v27, %v2507_v23  ;;  %v1042_v31 = vpop.f32.mrb[13].mxu1  ;;  %v726_v32 = vadd.f32 %v725_v30, %v2509_v24  ;;  %v727_v34 = vpop.f32.mrb[14].mxu0 }
 0x1d0   : > { %v1043_v33 = vadd.f32 %v1042_v31, %v2511_v25  ;;  %v1044_v35 = vpop.f32.mrb[14].mxu1  ;;  %v728_v36 = vadd.f32 %v727_v34, %v2505_v22  ;;  %v729_v38 = vpop.f32.mrb[15].mxu0 }
 0x1d1   : > { %v1045_v37 = vadd.f32 %v1044_v35, %v2507_v23  ;;  %v1046_v39 = vpop.f32.mrb[15].mxu1  ;;  %v1660_v40 = vpack.c.bf16 %v726_v32, %v724_v28  ;;  %v730_v42 = vadd.f32 %v729_v38, %v2509_v24 }
 0x1d2   : > { %v1676_v41 = vpack.c.bf16 %v1043_v33, %v1041_v29  ;;  %v1047_v43 = vadd.f32 %v1046_v39, %v2511_v25 }
 0x1d3   : > { %1191 = vst [vmem:[%s2522_s29 + $0x30] sm:$0xff] %v1660_v40  ;;  %v1661_v44 = vpack.c.bf16 %v730_v42, %v728_v36 }
 0x1d4   : > { %1303 = vst [vmem:[%s2526_s7 + $0x30] sm:$0xff] %v1676_v41  ;;  %v1677_v45 = vpack.c.bf16 %v1047_v43, %v1045_v37 }
 0x1d5   : > { %1192 = vst [vmem:[%s2522_s29 + $0x38] sm:$0xff] %v1661_v44  ;;  %v733_v46 = vpop.f32.mrb[16].mxu0 }
 0x1d6   : > { %1304 = vst [vmem:[%s2526_s7 + $0x38] sm:$0xff] %v1677_v45  ;;  %v1050_v47 = vpop.f32.mrb[16].mxu1  ;;  %v734_v48 = vadd.f32 %v733_v46, %v2505_v22  ;;  %v735_v50 = vpop.f32.mrb[17].mxu0 }
 0x1d7   : > { %v1051_v49 = vadd.f32 %v1050_v47, %v2507_v23  ;;  %v1052_v51 = vpop.f32.mrb[17].mxu1  ;;  %v736_v52 = vadd.f32 %v735_v50, %v2509_v24  ;;  %v737_v54 = vpop.f32.mrb[18].mxu0 }
 0x1d8   : > { %v1053_v53 = vadd.f32 %v1052_v51, %v2511_v25  ;;  %v1054_v55 = vpop.f32.mrb[18].mxu1  ;;  %v738_v56 = vadd.f32 %v737_v54, %v2505_v22  ;;  %v739_v58 = vpop.f32.mrb[19].mxu0 }
 0x1d9   : > { %v1055_v57 = vadd.f32 %v1054_v55, %v2507_v23  ;;  %v1056_v59 = vpop.f32.mrb[19].mxu1  ;;  %v1662_v60 = vpack.c.bf16 %v736_v52, %v734_v48  ;;  %v740_v62 = vadd.f32 %v739_v58, %v2509_v24 }
 0x1da   : > { %v1678_v61 = vpack.c.bf16 %v1053_v53, %v1051_v49  ;;  %v1057_v63 = vadd.f32 %v1056_v59, %v2511_v25 }
 0x1db   : > { %1193 = vst [vmem:[%s2522_s29 + $0x40] sm:$0xff] %v1662_v60  ;;  %v1663_v0 = vpack.c.bf16 %v740_v62, %v738_v56 }
 0x1dc   : > { %1305 = vst [vmem:[%s2526_s7 + $0x40] sm:$0xff] %v1678_v61  ;;  %v1679_v1 = vpack.c.bf16 %v1057_v63, %v1055_v57 }
 0x1dd   : > { %1194 = vst [vmem:[%s2522_s29 + $0x48] sm:$0xff] %v1663_v0  ;;  %v743_v2 = vpop.f32.mrb[20].mxu0 }
 0x1de   : > { %1306 = vst [vmem:[%s2526_s7 + $0x48] sm:$0xff] %v1679_v1  ;;  %v1060_v3 = vpop.f32.mrb[20].mxu1  ;;  %v744_v4 = vadd.f32 %v743_v2, %v2505_v22  ;;  %v745_v6 = vpop.f32.mrb[21].mxu0 }
 0x1df   : > { %v1061_v5 = vadd.f32 %v1060_v3, %v2507_v23  ;;  %v1062_v7 = vpop.f32.mrb[21].mxu1  ;;  %v746_v8 = vadd.f32 %v745_v6, %v2509_v24  ;;  %v747_v10 = vpop.f32.mrb[22].mxu0 }
 0x1e0   : > { %v1063_v9 = vadd.f32 %v1062_v7, %v2511_v25  ;;  %v1064_v11 = vpop.f32.mrb[22].mxu1  ;;  %v748_v12 = vadd.f32 %v747_v10, %v2505_v22  ;;  %v749_v14 = vpop.f32.mrb[23].mxu0 }
 0x1e1   : > { %v1065_v13 = vadd.f32 %v1064_v11, %v2507_v23  ;;  %v1066_v15 = vpop.f32.mrb[23].mxu1  ;;  %v1664_v16 = vpack.c.bf16 %v746_v8, %v744_v4  ;;  %v750_v18 = vadd.f32 %v749_v14, %v2509_v24 }
 0x1e2   : > { %v1680_v17 = vpack.c.bf16 %v1063_v9, %v1061_v5  ;;  %v1067_v19 = vadd.f32 %v1066_v15, %v2511_v25 }
 0x1e3   : > { %1195 = vst [vmem:[%s2522_s29 + $0x50] sm:$0xff] %v1664_v16  ;;  %v1665_v20 = vpack.c.bf16 %v750_v18, %v748_v12 }
 0x1e4   : > { %1307 = vst [vmem:[%s2526_s7 + $0x50] sm:$0xff] %v1680_v17  ;;  %v1681_v21 = vpack.c.bf16 %v1067_v19, %v1065_v13 }
 0x1e5   : > { %1196 = vst [vmem:[%s2522_s29 + $0x58] sm:$0xff] %v1665_v20  ;;  %v753_v26 = vpop.f32.mrb[24].mxu0 }
 0x1e6   : > { %1308 = vst [vmem:[%s2526_s7 + $0x58] sm:$0xff] %v1681_v21  ;;  %v1070_v27 = vpop.f32.mrb[24].mxu1  ;;  %v754_v28 = vadd.f32 %v753_v26, %v2505_v22  ;;  %v755_v30 = vpop.f32.mrb[25].mxu0 }
 0x1e7   : > { %v1071_v29 = vadd.f32 %v1070_v27, %v2507_v23  ;;  %v1072_v31 = vpop.f32.mrb[25].mxu1  ;;  %v756_v32 = vadd.f32 %v755_v30, %v2509_v24  ;;  %v757_v34 = vpop.f32.mrb[26].mxu0 }
 0x1e8   : > { %v1073_v33 = vadd.f32 %v1072_v31, %v2511_v25  ;;  %v1074_v35 = vpop.f32.mrb[26].mxu1  ;;  %v758_v36 = vadd.f32 %v757_v34, %v2505_v22  ;;  %v759_v38 = vpop.f32.mrb[27].mxu0 }
 0x1e9   : > { %v1075_v37 = vadd.f32 %v1074_v35, %v2507_v23  ;;  %v1076_v39 = vpop.f32.mrb[27].mxu1  ;;  %v1666_v40 = vpack.c.bf16 %v756_v32, %v754_v28  ;;  %v760_v42 = vadd.f32 %v759_v38, %v2509_v24 }
 0x1ea   : > { %v1682_v41 = vpack.c.bf16 %v1073_v33, %v1071_v29  ;;  %v1077_v43 = vadd.f32 %v1076_v39, %v2511_v25 }
 0x1eb   : > { %1197 = vst [vmem:[%s2522_s29 + $0x60] sm:$0xff] %v1666_v40  ;;  %v1667_v44 = vpack.c.bf16 %v760_v42, %v758_v36 }
 0x1ec   : > { %1309 = vst [vmem:[%s2526_s7 + $0x60] sm:$0xff] %v1682_v41  ;;  %v1683_v45 = vpack.c.bf16 %v1077_v43, %v1075_v37 }
 0x1ed   : > { %1198 = vst [vmem:[%s2522_s29 + $0x68] sm:$0xff] %v1667_v44  ;;  %v763_v46 = vpop.f32.mrb[28].mxu0 }
 0x1ee   : > { %1310 = vst [vmem:[%s2526_s7 + $0x68] sm:$0xff] %v1683_v45  ;;  %v1080_v47 = vpop.f32.mrb[28].mxu1  ;;  %v764_v48 = vadd.f32 %v763_v46, %v2505_v22  ;;  %v765_v50 = vpop.f32.mrb[29].mxu0 }
 0x1ef   : > { %v1081_v49 = vadd.f32 %v1080_v47, %v2507_v23  ;;  %v1082_v51 = vpop.f32.mrb[29].mxu1  ;;  %v766_v52 = vadd.f32 %v765_v50, %v2509_v24  ;;  %v767_v54 = vpop.f32.mrb[30].mxu0 }
 0x1f0   : > { %v1083_v53 = vadd.f32 %v1082_v51, %v2511_v25  ;;  %v1084_v55 = vpop.f32.mrb[30].mxu1  ;;  %v768_v56 = vadd.f32 %v767_v54, %v2505_v22  ;;  %v769_v58 = vpop.f32.mrb[31].mxu0 }
 0x1f1   : > { %v1085_v57 = vadd.f32 %v1084_v55, %v2507_v23  ;;  %v1086_v59 = vpop.f32.mrb[31].mxu1  ;;  %v1668_v60 = vpack.c.bf16 %v766_v52, %v764_v48  ;;  %v770_v62 = vadd.f32 %v769_v58, %v2509_v24 }
 0x1f2   : > { %v1684_v61 = vpack.c.bf16 %v1083_v53, %v1081_v49  ;;  %v1087_v63 = vadd.f32 %v1086_v59, %v2511_v25 }
 0x1f3   : > { %1199 = vst [vmem:[%s2522_s29 + $0x70] sm:$0xff] %v1668_v60  ;;  %v1669_v22 = vpack.c.bf16 %v770_v62, %v768_v56 }
 0x1f4   : > { %1311 = vst [vmem:[%s2526_s7 + $0x70] sm:$0xff] %v1684_v61  ;;  %v1685_v23 = vpack.c.bf16 %v1087_v63, %v1085_v57 }
 0x1f5   : > { %1200 = vst [vmem:[%s2522_s29 + $0x78] sm:$0xff] %v1669_v22 }
 0x1f6   : > { %1312 = vst [vmem:[%s2526_s7 + $0x78] sm:$0xff] %v1685_v23 }
 0x1f7   : > { %2075 = shalt.err (!%p2072_p0)
}
 0x1f8   : > { %s2076_s29 = scalar_lea.hbm %s2616_s11, 2048  ;;  %s2080_s24 = scalar_lea.hbm %s2714_s5, 4096 }
 0x1f9   : > { %p2077_p4 = scmp.ne.s32.totalorder %s2616_s11, %s2076_s29  ;;  %p2081_p12 = scmp.lt.u32.totalorder %s2616_s11, %s2714_s5 }
 0x1fa   : > { %p2082_p1 = scmp.lt.u32.totalorder %s2080_s24, %s2076_s29  ;;  %p2084_p2 = scmp.lt.u32.totalorder %s2076_s29, %s2616_s11 }
 0x1fb   : > { %p2078_p13 = pnand %p2077_p4, %p2410_p5 }
 0x1fc   : > { %p2083_p11 = por %p2082_p1, %p2081_p12 }
 0x1fd   : > { %p2079_p6 = pneg %p2078_p13 }
 0x1fe   : > { %p2085_p8 = por %p2084_p2, %p2083_p11 }
 0x200   : > { %p2086_p10 = pnand %p2085_p8, %p2079_p6 }
 0x202   : > { %2089 = shalt.err (!%p2086_p10)
}
 0x203   : > { %s2194_s15 = smov 128   ;;  %s2195_s8 = smov 8  }
 0x204   : > { %1706 = dma.vmem_to_hbm [thread:$0]  (%p2410_p5), %s2619_s17, 2048, %s2616_s11, %s1314_s19, %s2194_s15, %s2194_s15, %s2195_s8  }
 0x205   : > { %s1319_s27 = scalar_lea.sflag [#allocation13], %s2468_s21  ;;  %s2090_s14 = scalar_lea.vmem %s2628_s16, 2048 }
 0x206   : > { %p2091_p3 = scmp.ne.s32.totalorder %s2628_s16, %s2090_s14  ;;  %s2196_s13 = smov [#allocation12]  }
 0x207   : > { %s2094_s29 = sshll.u32 %s2196_s13, 4  ;;  %s2095_s29 = int_to_ptr.vmem [resolvable:$false] %s2094_s29 }
 0x208   : > { %p2092_p7 = pnand %p2091_p3, %p2410_p5  ;;  %s2096_s7 = scalar_lea.vmem %s2095_s29, 4096 }
 0x209   : > { %p2097_p0 = scmp.lt.s32.totalorder %s2628_s16, %s2095_s29  ;;  %p2098_p4 = scmp.lt.s32.totalorder %s2096_s7, %s2090_s14 }
 0x20a   : > { %p2093_p9 = pneg %p2092_p7 }
 0x20b   : > { %p2099_p13 = por %p2098_p4, %p2097_p0 }
 0x20d   : > { %p2100_p6 = pnand %p2099_p13, %p2093_p9 }
 0x20f   : > { %2103 = shalt.err (!%p2100_p6)
}
 0x210   : > { %s2104_s17 = scalar_lea.hbm %s2626_s30, 2048  ;;  %s2108_s9 = scalar_lea.hbm %s2739_s20, 4096 }
 0x211   : > { %p2105_p12 = scmp.ne.s32.totalorder %s2626_s30, %s2104_s17  ;;  %p2109_p2 = scmp.lt.u32.totalorder %s2626_s30, %s2739_s20 }
 0x212   : > { %p2110_p8 = scmp.lt.u32.totalorder %s2108_s9, %s2104_s17  ;;  %p2112_p3 = scmp.lt.u32.totalorder %s2104_s17, %s2626_s30 }
 0x213   : > { %p2106_p1 = pnand %p2105_p12, %p2410_p5 }
 0x214   : > { %p2111_p10 = por %p2110_p8, %p2109_p2 }
 0x215   : > { %p2107_p11 = pneg %p2106_p1 }
 0x216   : > { %p2113_p7 = por %p2112_p3, %p2111_p10 }
 0x218   : > { %p2114_p9 = pnand %p2113_p7, %p2107_p11 }
 0x21a   : > { %2117 = shalt.err (!%p2114_p9)
}
 0x21b   : > { %1707 = dma.vmem_to_hbm [thread:$0]  (%p2410_p5), %s2628_s16, 2048, %s2626_s30, %s1319_s27, %s2194_s15, %s2194_s15, %s2195_s8  }
 0x21c PF: > { %s2740_s6 = sld [smem:[#allocation19_spill]]  ;;  %s2741_s14 = sld [smem:[#allocation20_spill]] }
 0x21d   : > { %p2743_p4 = scmp.ge.s32.totalorder %s2184_s26, 2 }
 0x222   : > { %s1369_s13 = sand.u32 1, %s2740_s6   ;;  %p2742_p0 = scmp.ne.s32.totalorder %s2741_s14, 0 }
 0x223   : > { %s1370_s29 = scalar_lea.sflag [#allocation4], %s1369_s13 }
 0x224   : > { %p1728_p13 = pnand %p2743_p4, %p2742_p0 }
 0x226   : > { %2155 = dma.done.wait (!%p1728_p13), %s1370_s29, 2048  }
 0x227   : > { %2157 = vsyncadd (!%p1728_p13), %s1370_s29, 4294965248  ;;  %s1379_s12 = scalar_lea.sflag [#allocation13], %s1369_s13 }
 0x228   : > { %2159 = dma.done.wait (!%p1728_p13), %s1379_s12, 2048  }
 0x229   : > { %2161 = vsyncadd (!%p1728_p13), %s1379_s12, 4294965248  ;;  %s28_s26 = sadd.s32 1, %s2184_s26   ;;  %s2744_s21 = smov %s2168_s22 }
 0x22a   : > { %p25_p6 = scmp.ge.s32.totalorder %s28_s26, 4   ;;  %s2745_s22 = smov %s2172_s23 }
 0x22b   : > { %s2746_s23 = smov %s2419_s10  ;;  %s2747_s24 = smov %s2180_s25 }
 0x22c   : > { %s2748_s25 = smov %s2750_s28  ;;  %27 = sbr.rel (!%p25_p6) target bundleno = 12 (0xc), region = 118 }
 0x233   :  { %1384 = vsyncpa [#allocation3], 1 }
 0x234   :  { %1386 = vsyncpa [#allocation3 + $0x1], 1 }
 0x235   :  { %1387 = vsyncpa [#allocation6], 1 }
 0x236   :  { %1388 = vsyncpa [#allocation9], 1 }
 0x237   :  { %1389 = vsyncpa [#allocation4], 1 }
 0x238   :  { %1391 = vsyncpa [#allocation4 + $0x1], 1 }
 0x239   :  { %1392 = vsyncpa [#allocation13], 1 }
 0x23a   :  { %1394 = vsyncpa [#allocation13 + $0x1], 1 }

// kernel: tpu_custom_call.1
= control target key start
LH: loop header
LB: loop body
LE: loop exit
PB: predicated region body
PF: predicated region fallthrough
CT: control target
= control target key end

     0   :  { %s2709_s0 = inlined_call_operand.hbm [shape: bf16[2,128,256], index: 0, kind: input, shape index: {}]   ;;  %s2710_s1 = inlined_call_operand.hbm [shape: bf16[256,256], index: 1, kind: input, shape index: {}]   ;;  %s2711_s2 = inlined_call_operand.hbm [shape: f32[1,256], index: 2, kind: input, shape index: {}]   ;;  %s2712_s3 = inlined_call_operand.hbm [shape: bf16[256,256], index: 3, kind: input, shape index: {}]   ;;  %s2713_s4 = inlined_call_operand.hbm [shape: f32[1,256], index: 4, kind: input, shape index: {}]   ;;  %s2714_s5 = inlined_call_operand.hbm [shape: bf16[2,128,256], index: 5, kind: output, shape index: {0}]   ;;  %s2715_s6 = inlined_call_operand.hbm [shape: bf16[2,128,256], index: 6, kind: output, shape index: {1}]  }
   0x1   :  { %2723 = sst [smem:[#allocation21_spill]] %s2715_s6 }
   0x2   :  { %12 = vsyncpa [#allocation3], 0 }
   0x3   :  { %14 = vsyncpa [#allocation3 + $0x1], 0 }
   0x4   :  { %15 = vsyncpa [#allocation6], 0 }
   0x5   :  { %16 = vsyncpa [#allocation9], 0 }
   0x6   :  { %17 = vsyncpa [#allocation4], 0 }
   0x7   :  { %19 = vsyncpa [#allocation4 + $0x1], 0 }
   0x8   :  { %20 = vsyncpa [#allocation13], 0 }
   0x9   :  { %22 = vsyncpa [#allocation13 + $0x1], 0  ;;  %s2232_s21 = smov 0   ;;  %s2234_s22 = smov 0  }
   0xa   :  { %s2236_s23 = smov 0   ;;  %s2238_s24 = smov 0  }
   0xb   :  { %s2240_s25 = smov 0   ;;  %s2242_s26 = smov 0  }
   0xc LB: > { %2724 = sst [smem:[#allocation19_spill]] %s2164_s21  ;;  %s1514_s27 = sadd.s32 4294967295, %s2184_s26   ;;  %s2184_s26 = sphi %s2242_s26, %s28_s26   ;;  %s2180_s25 = sphi %s2240_s25, %s2748_s25   ;;  %s2176_s24 = sphi %s2238_s24, %s2747_s24   ;;  %s2172_s23 = sphi %s2236_s23, %s2746_s23   ;;  %s2168_s22 = sphi %s2234_s22, %s2745_s22   ;;  %s2164_s21 = sphi %s2232_s21, %s2744_s21  }
   0xd   : > { %s1515_s28 = sadd.s32 4294967294, %s2184_s26   ;;  %p62_p0 = scmp.ne.s32.totalorder %s2168_s22, %s2164_s21 }
   0xe   : > { %p2266_p1 = scmp.eq.s32.totalorder %s1514_s27, 0  ;;  %p2270_p2 = scmp.eq.s32.totalorder %s1514_s27, 1 }
   0xf   : > { %p178_p3 = scmp.eq.s32.totalorder %s1515_s28, 1  ;;  %p1516_p5 = scmp.ge.s32.totalorder %s2184_s26, 1 }
  0x10   : > { %s2725_s29 = scalar_select %p2266_p1, 1, 0 }
  0x11   : > { %s2726_s30 = scalar_select %p2270_p2, 1, 0 }
  0x12   : > { %p2276_p4 = por %p2266_p1, %p62_p0  ;;  %p2281_p6 = por %p178_p3, %p62_p0 }
  0x13   : > { %p213_p7 = scmp.lt.s32.totalorder %s2184_s26, 3  ;;  %s2186_s10 = smov [#allocation5]  }
  0x14   : > { %s2727_s7 = scalar_select %p2276_p4, 1, 0 }
  0x15   : > { %s2728_s8 = scalar_select %p2281_p6, 1, 0 }
  0x16   : > { %p2286_p8 = pnand %p1516_p5, %p213_p7  ;;  %s225_s11 = sshll.u32 %s2186_s10, 4  ;;  %s2290_s11 = int_to_ptr.vmem [resolvable:$true] %s225_s11 }
  0x17   : > { %2729 = sst [smem:[#allocation20_spill]] %s2728_s8  ;;  %s2187_s13 = smov [#allocation8]  }
  0x18   : > { %s2730_s9 = scalar_select %p2286_p8, 1, 0 }
  0x19   : > { %p1710_p9 = pneg %p2286_p8  ;;  %s249_s14 = sshll.u32 %s2187_s13, 4  ;;  %s2301_s14 = int_to_ptr.vmem [resolvable:$true] %s249_s14 }
  0x1a   : > { %s2188_s15 = smov [#allocation7]   ;;  %s1920_s19 = scalar_lea.hbm %s2710_s1, 4096 }
  0x1b   : > { %p2297_p11 = pnand %p1710_p9, %p2266_p1  ;;  %s2303_s16 = sshll.u32 %s2188_s15, 4  ;;  %s240_s16 = int_to_ptr.vmem [resolvable:$true] %s2303_s16 }
  0x1c   : > { %p1921_p12 = scmp.ne.s32.totalorder %s2710_s1, %s1920_s19  ;;  %p1927_p5 = scmp.lt.u32.totalorder %s1920_s19, %s2710_s1 }
  0x1d   : > { %p2313_p13 = pneg %p2297_p11 }
  0x1f   : > { %p1923_p0 = pnand %p2313_p13, %p1921_p12 }
  0x21   : > { %p1924_p3 = pneg %p1923_p0 }
  0x23   : > { %p1929_p7 = pnand %p1927_p5, %p1924_p3 }
  0x25   : > { %1932 = shalt.err (!%p1929_p7)
}
  0x26   : > { %s1933_s15 = scalar_lea.vmem %s2290_s11, 4096  ;;  %p1941_p1 = scmp.lt.s32.totalorder %s2290_s11, %s2290_s11 }
  0x27   : > { %p1934_p9 = scmp.ne.s32.totalorder %s2290_s11, %s1933_s15  ;;  %p1942_p4 = scmp.lt.s32.totalorder %s1933_s15, %s1933_s15 }
  0x29   : > { %p1936_p10 = pnand %p1934_p9, %p2313_p13  ;;  %p1943_p12 = por %p1942_p4, %p1941_p1 }
  0x2b   : > { %p1937_p6 = pneg %p1936_p10 }
  0x2d   : > { %p1944_p0 = pnand %p1943_p12, %p1937_p6 }
  0x2f   : > { %1947 = shalt.err (!%p1944_p0)
}
  0x30   : > { %s2189_s17 = smov 128   ;;  %s2190_s18 = smov 8  }
  0x31   : > { %1713 = dma.hbm_to_vmem [thread:$0]  (!%p2297_p11), %s2710_s1, 4096, %s2290_s11, [#allocation6], %s2189_s17, %s2189_s17, %s2190_s18  }
  0x32   : > { %s1948_s13 = scalar_lea.hbm %s2712_s3, 4096 }
  0x33   : > { %p1949_p1 = scmp.ne.s32.totalorder %s2712_s3, %s1948_s13  ;;  %p1955_p10 = scmp.lt.u32.totalorder %s1948_s13, %s2712_s3 }
  0x35   : > { %p1951_p4 = pnand %p1949_p1, %p2313_p13 }
  0x37   : > { %p1952_p6 = pneg %p1951_p4 }
  0x39   : > { %p1957_p3 = pnand %p1955_p10, %p1952_p6 }
  0x3b   : > { %1960 = shalt.err (!%p1957_p3)
}
  0x3c   : > { %s1961_s11 = scalar_lea.vmem %s2301_s14, 4096  ;;  %p1969_p12 = scmp.lt.s32.totalorder %s2301_s14, %s2301_s14 }
  0x3d   : > { %p1962_p5 = scmp.ne.s32.totalorder %s2301_s14, %s1961_s11  ;;  %p1970_p0 = scmp.lt.s32.totalorder %s1961_s11, %s1961_s11 }
  0x3f   : > { %p1964_p7 = pnand %p1962_p5, %p2313_p13  ;;  %p1971_p1 = por %p1970_p0, %p1969_p12 }
  0x41   : > { %p1965_p9 = pneg %p1964_p7 }
  0x43   : > { %p1972_p4 = pnand %p1971_p1, %p1965_p9 }
  0x45   : > { %1975 = shalt.err (!%p1972_p4)
}
  0x46   : > { %1719 = dma.hbm_to_vmem [thread:$0]  (!%p2297_p11), %s2712_s3, 4096, %s2301_s14, [#allocation9], %s2189_s17, %s2189_s17, %s2190_s18  }
  0x47   : > { %s1976_s20 = scalar_lea.hbm %s2711_s2, 32 }
  0x48   : > { %p1977_p6 = scmp.ne.s32.totalorder %s2711_s2, %s1976_s20  ;;  %p1983_p5 = scmp.lt.u32.totalorder %s1976_s20, %s2711_s2 }
  0x4a   : > { %p1979_p10 = pnand %p1977_p6, %p2313_p13 }
  0x4c   : > { %p1980_p3 = pneg %p1979_p10 }
  0x4e   : > { %p1985_p7 = pnand %p1983_p5, %p1980_p3 }
  0x50   : > { %1988 = shalt.err (!%p1985_p7)
}
  0x51   : > { %s1989_s11 = scalar_lea.vmem %s240_s16, 32  ;;  %p1997_p1 = scmp.lt.s32.totalorder %s240_s16, %s240_s16 }
  0x52   : > { %p1990_p9 = scmp.ne.s32.totalorder %s240_s16, %s1989_s11  ;;  %p1998_p4 = scmp.lt.s32.totalorder %s1989_s11, %s1989_s11 }
  0x54   : > { %p1992_p12 = pnand %p1990_p9, %p2313_p13  ;;  %p1999_p8 = por %p1998_p4, %p1997_p1 }
  0x56   : > { %p1993_p0 = pneg %p1992_p12 }
  0x58   : > { %p2000_p2 = pnand %p1999_p8, %p1993_p0 }
  0x5a   : > { %2003 = shalt.err (!%p2000_p2)
}
  0x5b   : > { %1716 = dma.hbm_to_vmem [thread:$0]  (!%p2297_p11), %s2711_s2, 32, %s240_s16, [#allocation6]  }
  0x5c   : > { %s2191_s21 = smov [#allocation10]   ;;  %s2004_s27 = scalar_lea.hbm %s2713_s4, 32 }
  0x5d   : > { %s263_s8 = sshll.u32 %s2191_s21, 4  ;;  %p2005_p6 = scmp.ne.s32.totalorder %s2713_s4, %s2004_s27  ;;  %s264_s8 = int_to_ptr.vmem [resolvable:$true] %s263_s8 }
  0x5e   : > { %p2011_p10 = scmp.lt.u32.totalorder %s2004_s27, %s2713_s4 }
  0x5f   : > { %p2007_p2 = pnand %p2005_p6, %p2313_p13 }
  0x61   : > { %p2008_p8 = pneg %p2007_p2 }
  0x63   : > { %p2013_p3 = pnand %p2011_p10, %p2008_p8 }
  0x65   : > { %2016 = shalt.err (!%p2013_p3)
}
  0x66   : > { %s2017_s16 = scalar_lea.vmem %s264_s8, 32  ;;  %p2025_p12 = scmp.lt.s32.totalorder %s264_s8, %s264_s8 }
  0x67   : > { %p2018_p5 = scmp.ne.s32.totalorder %s264_s8, %s2017_s16  ;;  %p2026_p0 = scmp.lt.s32.totalorder %s2017_s16, %s2017_s16 }
  0x69   : > { %p2020_p7 = pnand %p2018_p5, %p2313_p13  ;;  %p2027_p1 = por %p2026_p0, %p2025_p12 }
  0x6b   : > { %p2021_p9 = pneg %p2020_p7 }
  0x6d   : > { %p2028_p4 = pnand %p2027_p1, %p2021_p9 }
  0x6f   : > { %2031 = shalt.err (!%p2028_p4)
}
  0x70   : > { %1722 = dma.hbm_to_vmem [thread:$0]  (!%p2297_p11), %s2713_s4, 32, %s264_s8, [#allocation9]  }
  0x71   : > { %s40_s28 = sadd.s32 1, %s2180_s25  ;;  %s49_s21 = sadd.s32 1, %s2172_s23 }
  0x72   : > { %p42_p13 = scmp.ge.s32.totalorder %s40_s28, 2  ;;  %p56_p6 = scmp.ne.s32.totalorder %s2172_s23, %s2168_s22 }
  0x73   : > { %p57_p2 = scmp.eq.s32.totalorder %s2184_s26, 0  ;;  %p1738_p8 = scmp.lt.s32.totalorder %s2184_s26, 2 }
  0x74   : > { %s2750_s28 = smov (%p42_p13, %s40_s28), 0  ;;  %p2733_p3 = scmp.ne.s32.totalorder %s2726_s30, 0 }
  0x75   : > { %p58_p10 = por %p57_p2, %p56_p6  ;;  %s44_s19 = ssub.s32 %s2180_s25, %s2750_s28 }
  0x76   : > { %p2410_p5 = por %p2733_p3, %p56_p6  ;;  %s274_s20 = sand.u32 1, %s2172_s23  }
  0x77   : > { %p47_p7 = scmp.eq.s32.totalorder %s44_s19, 0  ;;  %s1522_s8 = sshll.u32 %s274_s20, 7 }
  0x78   : > { %s1653_s27 = sshll.u32 %s2180_s25, 11  ;;  %s278_s30 = scalar_lea.vmem [#allocation2], %s1522_s8 }
  0x79   : > { %s2419_s10 = scalar_select %p47_p7, %s2172_s23, %s49_s21  }
  0x7a   : > { %s2424_s11 = scalar_lea.hbm %s2709_s0, %s1653_s27  ;;  %s288_s16 = sshll.u32 %s278_s30, 4  ;;  %s2432_s16 = int_to_ptr.vmem [resolvable:$true] %s288_s16 }
  0x7b   : > { %p2428_p11 = pnand %p1738_p8, %p58_p10  ;;  %s2434_s6 = scalar_lea.sflag [#allocation3], %s274_s20 }
  0x7c   : > { %s2032_s21 = scalar_lea.hbm %s2424_s11, 2048  ;;  %s2037_s27 = scalar_lea.hbm %s2709_s0, 4096 }
  0x7d   : > { %p2033_p9 = scmp.ne.s32.totalorder %s2424_s11, %s2032_s21  ;;  %p2034_p12 = pneg %p2428_p11 }
  0x7e   : > { %p2038_p4 = scmp.lt.u32.totalorder %s2424_s11, %s2709_s0  ;;  %p2039_p13 = scmp.lt.u32.totalorder %s2037_s27, %s2032_s21 }
  0x7f   : > { %p2035_p0 = pnand %p2034_p12, %p2033_p9  ;;  %p2041_p2 = scmp.lt.u32.totalorder %s2032_s21, %s2424_s11 }
  0x80   : > { %p2040_p6 = por %p2039_p13, %p2038_p4 }
  0x81   : > { %p2036_p1 = pneg %p2035_p0 }
  0x82   : > { %p2042_p8 = por %p2041_p2, %p2040_p6 }
  0x84   : > { %p2043_p10 = pnand %p2042_p8, %p2036_p1 }
  0x86   : > { %2046 = shalt.err (!%p2043_p10)
}
  0x87   : > { %s2047_s20 = scalar_lea.vmem %s2432_s16, 2048  ;;  %s2192_s30 = smov [#allocation2]  }
  0x88   : > { %p2048_p3 = scmp.ne.s32.totalorder %s2432_s16, %s2047_s20  ;;  %s2052_s19 = sshll.u32 %s2192_s30, 4  ;;  %s2053_s19 = int_to_ptr.vmem [resolvable:$false] %s2052_s19 }
  0x89   : > { %s2054_s8 = scalar_lea.vmem %s2053_s19, 4096  ;;  %p2055_p0 = scmp.lt.s32.totalorder %s2432_s16, %s2053_s19 }
  0x8a   : > { %p2050_p7 = pnand %p2048_p3, %p2034_p12  ;;  %p2056_p4 = scmp.lt.s32.totalorder %s2054_s8, %s2047_s20 }
  0x8c   : > { %p2051_p9 = pneg %p2050_p7  ;;  %p2057_p13 = por %p2056_p4, %p2055_p0 }
  0x8e   : > { %p2058_p6 = pnand %p2057_p13, %p2051_p9 }
  0x90   : > { %2061 = shalt.err (!%p2058_p6)
}
  0x91   : > { %1726 = dma.hbm_to_vmem [thread:$0]  (!%p2428_p11), %s2424_s11, 2048, %s2432_s16, %s2434_s6, %s2189_s17, %s2189_s17, %s2190_s18  }
  0x92   : > { %p2736_p12 = scmp.ne.s32.totalorder %s2730_s9, 0 }
  0x93   : > { %s2468_s21 = sand.u32 (!%p2736_p12), 1, %s2168_s22   ;;  %p2737_p1 = scmp.ne.s32.totalorder (!%p2736_p12), %s2727_s7, 0 }
  0x94   : > { %300 = sbr.rel (%p2736_p12) target bundleno = 540 (0x21c), region = 40  ;;  %s2471_s27 = sshll.u32 (!%p2736_p12), %s2468_s21, 7 }
  0x95   : > { %s303_s14 = scalar_lea.sflag (!%p2736_p12), [#allocation3], %s2468_s21  ;;  %s2475_s13 = scalar_lea.vmem (!%p2736_p12), [#allocation2], %s2471_s27 }
  0x9b   : > { %2143 = dma.done.wait (%p2737_p1), %s303_s14, 2048  }
  0x9c   : > { %2145 = vsyncadd (%p2737_p1), %s303_s14, 4294965248  ;;  %p2738_p11 = scmp.ne.s32.totalorder %s2725_s29, 0 }
  0x9e   : > { %2147 = dma.done.wait (%p2738_p11), [#allocation6], 4128  }
  0x9f   : > { %2149 = vsyncadd (%p2738_p11), [#allocation6], 4294963168 }
  0xa0   : > { %2151 = dma.done.wait (%p2738_p11), [#allocation9], 4128  }
  0xa1   : > { %2153 = vsyncadd (%p2738_p11), [#allocation9], 4294963168  ;;  %v1800_v0 = vld [vmem:[#allocation5 + $0x4] ss:$8 sps:$4 sm:$0xff]   ;;  %v1804_v2 = vld [vmem:[#allocation5] ss:$8 sps:$4 sm:$0xff]  }
  0xa2   : > { %v1802_v1 = vld [vmem:[#allocation8 + $0x4] ss:$8 sps:$4 sm:$0xff]   ;;  %659 = vmatprep.subr.bf16.mxu0 %v1800_v0  ;;  %v1805_v3 = vld [vmem:[#allocation8] ss:$8 sps:$4 sm:$0xff]   ;;  %v1806_v4 = vld [vmem:[#allocation5 + $0x14] ss:$8 sps:$4 sm:$0xff]  }
  0xa3   : > { %976 = vmatprep.subr.bf16.mxu1 %v1802_v1  ;;  %660 = vmatpush1.bf16.msra.mxu0 %v1804_v2  ;;  %v1808_v5 = vld [vmem:[#allocation8 + $0x14] ss:$8 sps:$4 sm:$0xff]   ;;  %v1811_v7 = vld [vmem:[#allocation8 + $0x10] ss:$8 sps:$4 sm:$0xff]   ;;  %v1812_v8 = vld [vmem:[#allocation5 + $0x24] ss:$8 sps:$4 sm:$0xff]  }
  0xa4   : > { %977 = vmatpush1.bf16.msra.mxu1 %v1805_v3  ;;  %v1810_v6 = vld [vmem:[#allocation5 + $0x10] ss:$8 sps:$4 sm:$0xff]   ;;  %661 = vmatprep.subr.bf16.mxu0 %v1806_v4  ;;  %v1816_v10 = vld [vmem:[#allocation5 + $0x20] ss:$8 sps:$4 sm:$0xff]   ;;  %v1818_v12 = vld [vmem:[#allocation5 + $0x34] ss:$8 sps:$4 sm:$0xff]  }
  0xa5   : > { %978 = vmatprep.subr.bf16.mxu1 %v1808_v5  ;;  %v1814_v9 = vld [vmem:[#allocation8 + $0x24] ss:$8 sps:$4 sm:$0xff]   ;;  %v1817_v11 = vld [vmem:[#allocation8 + $0x20] ss:$8 sps:$4 sm:$0xff]   ;;  %v1820_v13 = vld [vmem:[#allocation8 + $0x34] ss:$8 sps:$4 sm:$0xff]  }
  0xa6   : > { %v1822_v14 = vld [vmem:[#allocation5 + $0x30] ss:$8 sps:$4 sm:$0xff]   ;;  %v1824_v16 = vld [vmem:[#allocation5 + $0x44] ss:$8 sps:$4 sm:$0xff]   ;;  %v1828_v18 = vld [vmem:[#allocation5 + $0x40] ss:$8 sps:$4 sm:$0xff]  }
  0xa7   : > { %662 = vmatpush1.bf16.msra.mxu0 %v1810_v6  ;;  %v1823_v15 = vld [vmem:[#allocation8 + $0x30] ss:$8 sps:$4 sm:$0xff]   ;;  %v1826_v17 = vld [vmem:[#allocation8 + $0x44] ss:$8 sps:$4 sm:$0xff]   ;;  %v1829_v19 = vld [vmem:[#allocation8 + $0x40] ss:$8 sps:$4 sm:$0xff]  }
  0xa8   : > { %979 = vmatpush1.bf16.msra.mxu1 %v1811_v7  ;;  %663 = vmatprep.subr.bf16.mxu0 %v1812_v8  ;;  %v1830_v20 = vld [vmem:[#allocation5 + $0x54] ss:$8 sps:$4 sm:$0xff]   ;;  %v1834_v22 = vld [vmem:[#allocation5 + $0x50] ss:$8 sps:$4 sm:$0xff]   ;;  %v1836_v24 = vld [vmem:[#allocation5 + $0x64] ss:$8 sps:$4 sm:$0xff]  }
  0xa9   : > { %980 = vmatprep.subr.bf16.mxu1 %v1814_v9  ;;  %v1832_v21 = vld [vmem:[#allocation8 + $0x54] ss:$8 sps:$4 sm:$0xff]   ;;  %v1835_v23 = vld [vmem:[#allocation8 + $0x50] ss:$8 sps:$4 sm:$0xff]   ;;  %v1838_v25 = vld [vmem:[#allocation8 + $0x64] ss:$8 sps:$4 sm:$0xff]  }
  0xaa   : > { %v1840_v26 = vld [vmem:[#allocation5 + $0x60] ss:$8 sps:$4 sm:$0xff]   ;;  %v1842_v28 = vld [vmem:[#allocation5 + $0x74] ss:$8 sps:$4 sm:$0xff]   ;;  %v1846_v30 = vld [vmem:[#allocation5 + $0x70] ss:$8 sps:$4 sm:$0xff]  }
  0xab   : > { %664 = vmatpush1.bf16.msra.mxu0 %v1816_v10  ;;  %v1841_v27 = vld [vmem:[#allocation8 + $0x60] ss:$8 sps:$4 sm:$0xff]   ;;  %v1844_v29 = vld [vmem:[#allocation8 + $0x74] ss:$8 sps:$4 sm:$0xff]   ;;  %v1847_v31 = vld [vmem:[#allocation8 + $0x70] ss:$8 sps:$4 sm:$0xff]  }
  0xac   : > { %981 = vmatpush1.bf16.msra.mxu1 %v1817_v11  ;;  %665 = vmatprep.subr.bf16.mxu0 %v1818_v12  ;;  %v1848_v32 = vld [vmem:[#allocation5 + $0x84] ss:$8 sps:$4 sm:$0xff]   ;;  %v1852_v34 = vld [vmem:[#allocation5 + $0x80] ss:$8 sps:$4 sm:$0xff]   ;;  %v1854_v36 = vld [vmem:[#allocation5 + $0x94] ss:$8 sps:$4 sm:$0xff]  }
  0xad   : > { %982 = vmatprep.subr.bf16.mxu1 %v1820_v13  ;;  %v1850_v33 = vld [vmem:[#allocation8 + $0x84] ss:$8 sps:$4 sm:$0xff]   ;;  %v1853_v35 = vld [vmem:[#allocation8 + $0x80] ss:$8 sps:$4 sm:$0xff]   ;;  %v1856_v37 = vld [vmem:[#allocation8 + $0x94] ss:$8 sps:$4 sm:$0xff]  }
  0xae   : > { %v1858_v38 = vld [vmem:[#allocation5 + $0x90] ss:$8 sps:$4 sm:$0xff]   ;;  %v1860_v40 = vld [vmem:[#allocation5 + $0xa4] ss:$8 sps:$4 sm:$0xff]   ;;  %v1864_v42 = vld [vmem:[#allocation5 + $0xa0] ss:$8 sps:$4 sm:$0xff]  }
  0xaf   : > { %666 = vmatpush1.bf16.msra.mxu0 %v1822_v14  ;;  %v1859_v39 = vld [vmem:[#allocation8 + $0x90] ss:$8 sps:$4 sm:$0xff]   ;;  %v1862_v41 = vld [vmem:[#allocation8 + $0xa4] ss:$8 sps:$4 sm:$0xff]   ;;  %v1865_v43 = vld [vmem:[#allocation8 + $0xa0] ss:$8 sps:$4 sm:$0xff]  }
  0xb0   : > { %983 = vmatpush1.bf16.msra.mxu1 %v1823_v15  ;;  %667 = vmatprep.subr.bf16.mxu0 %v1824_v16  ;;  %v1866_v44 = vld [vmem:[#allocation5 + $0xb4] ss:$8 sps:$4 sm:$0xff]   ;;  %v1870_v46 = vld [vmem:[#allocation5 + $0xb0] ss:$8 sps:$4 sm:$0xff]   ;;  %v1898_v48 = vld [vmem:[%s2475_s13 + $0x4] ss:$8 sps:$4 sm:$0xff]   ;;  %v409_v16 = vlaneseq }
  0xb1   : > { %984 = vmatprep.subr.bf16.mxu1 %v1826_v17  ;;  %v1868_v45 = vld [vmem:[#allocation8 + $0xb4] ss:$8 sps:$4 sm:$0xff]   ;;  %v1871_v47 = vld [vmem:[#allocation8 + $0xb0] ss:$8 sps:$4 sm:$0xff]   ;;  %v1872_v49 = vld [vmem:[#allocation5 + $0xc4] ss:$8 sps:$4 sm:$0xff]   ;;  %691 = vmatprep.mubr.bf16.mxu0 %v1898_v48 }
  0xb2   : > { %v1874_v50 = vld [vmem:[#allocation8 + $0xc4] ss:$8 sps:$4 sm:$0xff]   ;;  %1008 = vmatprep.mubr.bf16.mxu1 %v1898_v48  ;;  %v1877_v52 = vld [vmem:[#allocation8 + $0xc0] ss:$8 sps:$4 sm:$0xff]   ;;  %v1878_v53 = vld [vmem:[#allocation5 + $0xd4] ss:$8 sps:$4 sm:$0xff]  }
  0xb3   : > { %668 = vmatpush1.bf16.msra.mxu0 %v1828_v18  ;;  %v1876_v51 = vld [vmem:[#allocation5 + $0xc0] ss:$8 sps:$4 sm:$0xff]   ;;  %v1882_v55 = vld [vmem:[#allocation5 + $0xd0] ss:$8 sps:$4 sm:$0xff]   ;;  %v1884_v57 = vld [vmem:[#allocation5 + $0xe4] ss:$8 sps:$4 sm:$0xff]  }
  0xb4   : > { %985 = vmatpush1.bf16.msra.mxu1 %v1829_v19  ;;  %669 = vmatprep.subr.bf16.mxu0 %v1830_v20  ;;  %v1880_v54 = vld [vmem:[#allocation8 + $0xd4] ss:$8 sps:$4 sm:$0xff]   ;;  %v1883_v56 = vld [vmem:[#allocation8 + $0xd0] ss:$8 sps:$4 sm:$0xff]   ;;  %v1886_v58 = vld [vmem:[#allocation8 + $0xe4] ss:$8 sps:$4 sm:$0xff]  }
  0xb5   : > { %986 = vmatprep.subr.bf16.mxu1 %v1832_v21  ;;  %v1888_v59 = vld [vmem:[#allocation5 + $0xe0] ss:$8 sps:$4 sm:$0xff]   ;;  %v1890_v61 = vld [vmem:[#allocation5 + $0xf4] ss:$8 sps:$4 sm:$0xff]   ;;  %v1894_v63 = vld [vmem:[#allocation5 + $0xf0] ss:$8 sps:$4 sm:$0xff]  }
  0xb6   : > { %v1889_v60 = vld [vmem:[#allocation8 + $0xe0] ss:$8 sps:$4 sm:$0xff]   ;;  %v1892_v62 = vld [vmem:[#allocation8 + $0xf4] ss:$8 sps:$4 sm:$0xff]   ;;  %v1895_v0 = vld [vmem:[#allocation8 + $0xf0] ss:$8 sps:$4 sm:$0xff]  }
  0xb7   : > { %670 = vmatpush1.bf16.msra.mxu0 %v1834_v22  ;;  %v1896_v1 = vld [vmem:[%s2475_s13] ss:$8 sps:$4 sm:$0xff]   ;;  %v1899_v2 = vld [vmem:[%s2475_s13 + $0x14] ss:$8 sps:$4 sm:$0xff]   ;;  %v1901_v3 = vld [vmem:[%s2475_s13 + $0x10] ss:$8 sps:$4 sm:$0xff]  }
  0xb8   : > { %987 = vmatpush1.bf16.msra.mxu1 %v1835_v23  ;;  %671 = vmatprep.subr.bf16.mxu0 %v1836_v24  ;;  %v1902_v4 = vld [vmem:[%s2475_s13 + $0x24] ss:$8 sps:$4 sm:$0xff]   ;;  %v1904_v5 = vld [vmem:[%s2475_s13 + $0x20] ss:$8 sps:$4 sm:$0xff]   ;;  %v1905_v6 = vld [vmem:[%s2475_s13 + $0x34] ss:$8 sps:$4 sm:$0xff]  }
  0xb9   : > { %988 = vmatprep.subr.bf16.mxu1 %v1838_v25  ;;  %v1907_v7 = vld [vmem:[%s2475_s13 + $0x30] ss:$8 sps:$4 sm:$0xff]   ;;  %v1908_v8 = vld [vmem:[%s2475_s13 + $0x44] ss:$8 sps:$4 sm:$0xff]   ;;  %v1910_v9 = vld [vmem:[%s2475_s13 + $0x40] ss:$8 sps:$4 sm:$0xff]  }
  0xba   : > { %v1911_v10 = vld [vmem:[%s2475_s13 + $0x54] ss:$8 sps:$4 sm:$0xff]   ;;  %v1913_v11 = vld [vmem:[%s2475_s13 + $0x50] ss:$8 sps:$4 sm:$0xff]   ;;  %v1914_v12 = vld [vmem:[%s2475_s13 + $0x64] ss:$8 sps:$4 sm:$0xff]  }
  0xbb   : > { %672 = vmatpush1.bf16.msra.mxu0 %v1840_v26  ;;  %v1916_v13 = vld [vmem:[%s2475_s13 + $0x60] ss:$8 sps:$4 sm:$0xff]   ;;  %v1917_v14 = vld [vmem:[%s2475_s13 + $0x74] ss:$8 sps:$4 sm:$0xff]   ;;  %v1919_v15 = vld [vmem:[%s2475_s13 + $0x70] ss:$8 sps:$4 sm:$0xff]  }
  0xbc   : > { %989 = vmatpush1.bf16.msra.mxu1 %v1841_v27  ;;  %673 = vmatprep.subr.bf16.mxu0 %v1842_v28  ;;  %v410_v17 = vshrl.u32 %v409_v16, 7  ;;  %v407_v19 = vld [vmem:[#allocation7] sm:$0x3]  ;;  %v804_v20 = vld [vmem:[#allocation10] sm:$0x3]  ;;  %s2522_s29 = scalar_lea.vmem [#allocation11], %s2471_s27 }
  0xbd   : > { %990 = vmatprep.subr.bf16.mxu1 %v1844_v29  ;;  %s2526_s7 = scalar_lea.vmem [#allocation12], %s2471_s27  ;;  %s1686_s9 = sshll.u32 %s2176_s24, 11 }
  0xbe   : > { %v411_v18 = vsub.s32 0, %v410_v17  ;;  %v415_v21 = vsub.s32 1, %v410_v17  ;;  %s1335_s17 = sshll.u32 %s2522_s29, 4  ;;  %s2616_s11 = scalar_lea.hbm %s2714_s5, %s1686_s9  ;;  %s2619_s17 = int_to_ptr.vmem [resolvable:$true] %s1335_s17 }
  0xbf   : > { %674 = vmatpush1.bf16.msra.mxu0 %v1846_v30  ;;  %s1354_s16 = sshll.u32 %s2526_s7, 4  ;;  %s2739_s20 = sld [smem:[#allocation21_spill]]  ;;  %s2628_s16 = int_to_ptr.vmem [resolvable:$true] %s1354_s16 }
  0xc0   : > { %991 = vmatpush1.bf16.msra.mxu1 %v1847_v31  ;;  %675 = vmatprep.subr.bf16.mxu0 %v1848_v32  ;;  %v2505_v22 = vrot.slane %v407_v19, %v411_v18  ;;  %v2507_v23 = vrot.slane %v804_v20, %v411_v18  ;;  %v2509_v24 = vrot.slane %v407_v19, %v415_v21  ;;  %s1314_s19 = scalar_lea.sflag [#allocation4], %s2468_s21  ;;  %s2062_s8 = scalar_lea.vmem %s2619_s17, 2048 }
  0xc1   : > { %992 = vmatprep.subr.bf16.mxu1 %v1850_v33  ;;  %v2511_v25 = vrot.slane %v804_v20, %v415_v21  ;;  %p2063_p2 = scmp.ne.s32.totalorder %s2619_s17, %s2062_s8  ;;  %s2193_s27 = smov [#allocation11]  }
  0xc2   : > { %s2066_s14 = sshll.u32 %s2193_s27, 4  ;;  %s2067_s14 = int_to_ptr.vmem [resolvable:$false] %s2066_s14 }
  0xc3   : > { %676 = vmatpush1.bf16.msra.mxu0 %v1852_v34  ;;  %p2064_p8 = pnand %p2063_p2, %p2410_p5  ;;  %s2068_s13 = scalar_lea.vmem %s2067_s14, 4096 }
  0xc4   : > { %993 = vmatpush1.bf16.msra.mxu1 %v1853_v35  ;;  %677 = vmatprep.subr.bf16.mxu0 %v1854_v36  ;;  %p2069_p3 = scmp.lt.s32.totalorder %s2619_s17, %s2067_s14  ;;  %p2070_p7 = scmp.lt.s32.totalorder %s2068_s13, %s2062_s8 }
  0xc5   : > { %994 = vmatprep.subr.bf16.mxu1 %v1856_v37  ;;  %s2626_s30 = scalar_lea.hbm %s2739_s20, %s1686_s9  ;;  %p2065_p10 = pneg %p2064_p8 }
  0xc6   : > { %p2071_p9 = por %p2070_p7, %p2069_p3 }
  0xc7   : > { %678 = vmatpush1.bf16.msra.mxu0 %v1858_v38 }
  0xc8   : > { %995 = vmatpush1.bf16.msra.mxu1 %v1859_v39  ;;  %679 = vmatprep.subr.bf16.mxu0 %v1860_v40  ;;  %p2072_p0 = pnand %p2071_p9, %p2065_p10 }
  0xc9   : > { %996 = vmatprep.subr.bf16.mxu1 %v1862_v41 }
  0xcb   : > { %680 = vmatpush1.bf16.msra.mxu0 %v1864_v42 }
  0xcc   : > { %997 = vmatpush1.bf16.msra.mxu1 %v1865_v43  ;;  %681 = vmatprep.subr.bf16.mxu0 %v1866_v44 }
  0xcd   : > { %998 = vmatprep.subr.bf16.mxu1 %v1868_v45 }
  0xcf   : > { %682 = vmatpush1.bf16.msra.mxu0 %v1870_v46 }
  0xd0   : > { %999 = vmatpush1.bf16.msra.mxu1 %v1871_v47  ;;  %683 = vmatprep.subr.bf16.mxu0 %v1872_v49 }
  0xd1   : > { %1000 = vmatprep.subr.bf16.mxu1 %v1874_v50 }
  0xd3   : > { %684 = vmatpush1.bf16.msra.mxu0 %v1876_v51 }
  0xd4   : > { %1001 = vmatpush1.bf16.msra.mxu1 %v1877_v52  ;;  %685 = vmatprep.subr.bf16.mxu0 %v1878_v53 }
  0xd5   : > { %1002 = vmatprep.subr.bf16.mxu1 %v1880_v54 }
  0xd7   : > { %686 = vmatpush1.bf16.msra.mxu0 %v1882_v55 }
  0xd8   : > { %1003 = vmatpush1.bf16.msra.mxu1 %v1883_v56  ;;  %687 = vmatprep.subr.bf16.mxu0 %v1884_v57 }
  0xd9   : > { %1004 = vmatprep.subr.bf16.mxu1 %v1886_v58 }
  0xdb   : > { %688 = vmatpush1.bf16.msra.mxu0 %v1888_v59 }
  0xdc   : > { %1005 = vmatpush1.bf16.msra.mxu1 %v1889_v60  ;;  %689 = vmatprep.subr.bf16.mxu0 %v1890_v61 }
  0xdd   : > { %1006 = vmatprep.subr.bf16.mxu1 %v1892_v62 }
  0xdf   : > { %690 = vmatpush1.bf16.msra.mxu0 %v1894_v63 }
  0xe0   : > { %1007 = vmatpush1.bf16.msra.mxu1 %v1895_v0 }
  0xe2   : > { %692 = vmatmul.mubr.bf16.vlgmr.msra.gmra.mrb[0].mxu0 %v1896_v1 }
  0xe3   : > { %1009 = vmatmul.mubr.bf16.vlgmr.msra.gmra.mrb[0].mxu1 %v1896_v1  ;;  %701 = vmatprep.mubr.bf16.mxu0 %v1899_v2 }
  0xe4   : > { %1018 = vmatprep.mubr.bf16.mxu1 %v1899_v2 }
  0xea   : > { %702 = vmatmul.mubr.bf16.gmra.mrb[4].mxu0 %v1901_v3 }
  0xeb   : > { %1019 = vmatmul.mubr.bf16.gmra.mrb[4].mxu1 %v1901_v3  ;;  %711 = vmatprep.mubr.bf16.mxu0 %v1902_v4 }
  0xec   : > { %1028 = vmatprep.mubr.bf16.mxu1 %v1902_v4 }
  0xf2   : > { %712 = vmatmul.mubr.bf16.gmra.mrb[8].mxu0 %v1904_v5 }
  0xf3   : > { %1029 = vmatmul.mubr.bf16.gmra.mrb[8].mxu1 %v1904_v5  ;;  %721 = vmatprep.mubr.bf16.mxu0 %v1905_v6 }
  0xf4   : > { %1038 = vmatprep.mubr.bf16.mxu1 %v1905_v6 }
  0xfa   : > { %722 = vmatmul.mubr.bf16.gmra.mrb[12].mxu0 %v1907_v7 }
  0xfb   : > { %1039 = vmatmul.mubr.bf16.gmra.mrb[12].mxu1 %v1907_v7  ;;  %731 = vmatprep.mubr.bf16.mxu0 %v1908_v8 }
  0xfc   : > { %1048 = vmatprep.mubr.bf16.mxu1 %v1908_v8 }
 0x102   : > { %732 = vmatmul.mubr.bf16.gmra.mrb[16].mxu0 %v1910_v9 }
 0x103   : > { %1049 = vmatmul.mubr.bf16.gmra.mrb[16].mxu1 %v1910_v9  ;;  %741 = vmatprep.mubr.bf16.mxu0 %v1911_v10 }
 0x104   : > { %1058 = vmatprep.mubr.bf16.mxu1 %v1911_v10 }
 0x10a   : > { %742 = vmatmul.mubr.bf16.gmra.mrb[20].mxu0 %v1913_v11 }
 0x10b   : > { %1059 = vmatmul.mubr.bf16.gmra.mrb[20].mxu1 %v1913_v11  ;;  %751 = vmatprep.mubr.bf16.mxu0 %v1914_v12 }
 0x10c   : > { %1068 = vmatprep.mubr.bf16.mxu1 %v1914_v12 }
 0x112   : > { %752 = vmatmul.mubr.bf16.gmra.mrb[24].mxu0 %v1916_v13 }
 0x113   : > { %1069 = vmatmul.mubr.bf16.gmra.mrb[24].mxu1 %v1916_v13  ;;  %761 = vmatprep.mubr.bf16.mxu0 %v1917_v14 }
 0x114   : > { %1078 = vmatprep.mubr.bf16.mxu1 %v1917_v14 }
 0x11a   : > { %762 = vmatmul.mubr.bf16.gmra.mrb[28].mxu0 %v1919_v15 }
 0x11b   : > { %1079 = vmatmul.mubr.bf16.gmra.mrb[28].mxu1 %v1919_v15 }
 0x1b5   : > { %v693_v26 = vpop.f32.mrb[0].mxu0 }
 0x1b6   : > { %v1010_v27 = vpop.f32.mrb[0].mxu1  ;;  %v694_v28 = vadd.f32 %v693_v26, %v2505_v22  ;;  %v695_v30 = vpop.f32.mrb[1].mxu0 }
 0x1b7   : > { %v1011_v29 = vadd.f32 %v1010_v27, %v2507_v23  ;;  %v1012_v31 = vpop.f32.mrb[1].mxu1  ;;  %v696_v32 = vadd.f32 %v695_v30, %v2509_v24  ;;  %v697_v34 = vpop.f32.mrb[2].mxu0 }
 0x1b8   : > { %v1013_v33 = vadd.f32 %v1012_v31, %v2511_v25  ;;  %v1014_v35 = vpop.f32.mrb[2].mxu1  ;;  %v698_v36 = vadd.f32 %v697_v34, %v2505_v22  ;;  %v699_v38 = vpop.f32.mrb[3].mxu0 }
 0x1b9   : > { %v1015_v37 = vadd.f32 %v1014_v35, %v2507_v23  ;;  %v1016_v39 = vpop.f32.mrb[3].mxu1  ;;  %v1654_v40 = vpack.c.bf16 %v696_v32, %v694_v28  ;;  %v700_v42 = vadd.f32 %v699_v38, %v2509_v24 }
 0x1ba   : > { %v1670_v41 = vpack.c.bf16 %v1013_v33, %v1011_v29  ;;  %v1017_v43 = vadd.f32 %v1016_v39, %v2511_v25 }
 0x1bb   : > { %1185 = vst [vmem:[%s2522_s29] sm:$0xff] %v1654_v40  ;;  %v1655_v44 = vpack.c.bf16 %v700_v42, %v698_v36 }
 0x1bc   : > { %1297 = vst [vmem:[%s2526_s7] sm:$0xff] %v1670_v41  ;;  %v1671_v45 = vpack.c.bf16 %v1017_v43, %v1015_v37 }
 0x1bd   : > { %1186 = vst [vmem:[%s2522_s29 + $0x8] sm:$0xff] %v1655_v44  ;;  %v703_v46 = vpop.f32.mrb[4].mxu0 }
 0x1be   : > { %1298 = vst [vmem:[%s2526_s7 + $0x8] sm:$0xff] %v1671_v45  ;;  %v1020_v47 = vpop.f32.mrb[4].mxu1  ;;  %v704_v48 = vadd.f32 %v703_v46, %v2505_v22  ;;  %v705_v50 = vpop.f32.mrb[5].mxu0 }
 0x1bf   : > { %v1021_v49 = vadd.f32 %v1020_v47, %v2507_v23  ;;  %v1022_v51 = vpop.f32.mrb[5].mxu1  ;;  %v706_v52 = vadd.f32 %v705_v50, %v2509_v24  ;;  %v707_v54 = vpop.f32.mrb[6].mxu0 }
 0x1c0   : > { %v1023_v53 = vadd.f32 %v1022_v51, %v2511_v25  ;;  %v1024_v55 = vpop.f32.mrb[6].mxu1  ;;  %v708_v56 = vadd.f32 %v707_v54, %v2505_v22  ;;  %v709_v58 = vpop.f32.mrb[7].mxu0 }
 0x1c1   : > { %v1025_v57 = vadd.f32 %v1024_v55, %v2507_v23  ;;  %v1026_v59 = vpop.f32.mrb[7].mxu1  ;;  %v1656_v60 = vpack.c.bf16 %v706_v52, %v704_v48  ;;  %v710_v62 = vadd.f32 %v709_v58, %v2509_v24 }
 0x1c2   : > { %v1672_v61 = vpack.c.bf16 %v1023_v53, %v1021_v49  ;;  %v1027_v63 = vadd.f32 %v1026_v59, %v2511_v25 }
 0x1c3   : > { %1187 = vst [vmem:[%s2522_s29 + $0x10] sm:$0xff] %v1656_v60  ;;  %v1657_v0 = vpack.c.bf16 %v710_v62, %v708_v56 }
 0x1c4   : > { %1299 = vst [vmem:[%s2526_s7 + $0x10] sm:$0xff] %v1672_v61  ;;  %v1673_v1 = vpack.c.bf16 %v1027_v63, %v1025_v57 }
 0x1c5   : > { %1188 = vst [vmem:[%s2522_s29 + $0x18] sm:$0xff] %v1657_v0  ;;  %v713_v2 = vpop.f32.mrb[8].mxu0 }
 0x1c6   : > { %1300 = vst [vmem:[%s2526_s7 + $0x18] sm:$0xff] %v1673_v1  ;;  %v1030_v3 = vpop.f32.mrb[8].mxu1  ;;  %v714_v4 = vadd.f32 %v713_v2, %v2505_v22  ;;  %v715_v6 = vpop.f32.mrb[9].mxu0 }
 0x1c7   : > { %v1031_v5 = vadd.f32 %v1030_v3, %v2507_v23  ;;  %v1032_v7 = vpop.f32.mrb[9].mxu1  ;;  %v716_v8 = vadd.f32 %v715_v6, %v2509_v24  ;;  %v717_v10 = vpop.f32.mrb[10].mxu0 }
 0x1c8   : > { %v1033_v9 = vadd.f32 %v1032_v7, %v2511_v25  ;;  %v1034_v11 = vpop.f32.mrb[10].mxu1  ;;  %v718_v12 = vadd.f32 %v717_v10, %v2505_v22  ;;  %v719_v14 = vpop.f32.mrb[11].mxu0 }
 0x1c9   : > { %v1035_v13 = vadd.f32 %v1034_v11, %v2507_v23  ;;  %v1036_v15 = vpop.f32.mrb[11].mxu1  ;;  %v1658_v16 = vpack.c.bf16 %v716_v8, %v714_v4  ;;  %v720_v18 = vadd.f32 %v719_v14, %v2509_v24 }
 0x1ca   : > { %v1674_v17 = vpack.c.bf16 %v1033_v9, %v1031_v5  ;;  %v1037_v19 = vadd.f32 %v1036_v15, %v2511_v25 }
 0x1cb   : > { %1189 = vst [vmem:[%s2522_s29 + $0x20] sm:$0xff] %v1658_v16  ;;  %v1659_v20 = vpack.c.bf16 %v720_v18, %v718_v12 }
 0x1cc   : > { %1301 = vst [vmem:[%s2526_s7 + $0x20] sm:$0xff] %v1674_v17  ;;  %v1675_v21 = vpack.c.bf16 %v1037_v19, %v1035_v13 }
 0x1cd   : > { %1190 = vst [vmem:[%s2522_s29 + $0x28] sm:$0xff] %v1659_v20  ;;  %v723_v26 = vpop.f32.mrb[12].mxu0 }
 0x1ce   : > { %1302 = vst [vmem:[%s2526_s7 + $0x28] sm:$0xff] %v1675_v21  ;;  %v1040_v27 = vpop.f32.mrb[12].mxu1  ;;  %v724_v28 = vadd.f32 %v723_v26, %v2505_v22  ;;  %v725_v30 = vpop.f32.mrb[13].mxu0 }
 0x1cf   : > { %v1041_v29 = vadd.f32 %v1040_v27, %v2507_v23  ;;  %v1042_v31 = vpop.f32.mrb[13].mxu1  ;;  %v726_v32 = vadd.f32 %v725_v30, %v2509_v24  ;;  %v727_v34 = vpop.f32.mrb[14].mxu0 }
 0x1d0   : > { %v1043_v33 = vadd.f32 %v1042_v31, %v2511_v25  ;;  %v1044_v35 = vpop.f32.mrb[14].mxu1  ;;  %v728_v36 = vadd.f32 %v727_v34, %v2505_v22  ;;  %v729_v38 = vpop.f32.mrb[15].mxu0 }
 0x1d1   : > { %v1045_v37 = vadd.f32 %v1044_v35, %v2507_v23  ;;  %v1046_v39 = vpop.f32.mrb[15].mxu1  ;;  %v1660_v40 = vpack.c.bf16 %v726_v32, %v724_v28  ;;  %v730_v42 = vadd.f32 %v729_v38, %v2509_v24 }
 0x1d2   : > { %v1676_v41 = vpack.c.bf16 %v1043_v33, %v1041_v29  ;;  %v1047_v43 = vadd.f32 %v1046_v39, %v2511_v25 }
 0x1d3   : > { %1191 = vst [vmem:[%s2522_s29 + $0x30] sm:$0xff] %v1660_v40  ;;  %v1661_v44 = vpack.c.bf16 %v730_v42, %v728_v36 }
 0x1d4   : > { %1303 = vst [vmem:[%s2526_s7 + $0x30] sm:$0xff] %v1676_v41  ;;  %v1677_v45 = vpack.c.bf16 %v1047_v43, %v1045_v37 }
 0x1d5   : > { %1192 = vst [vmem:[%s2522_s29 + $0x38] sm:$0xff] %v1661_v44  ;;  %v733_v46 = vpop.f32.mrb[16].mxu0 }
 0x1d6   : > { %1304 = vst [vmem:[%s2526_s7 + $0x38] sm:$0xff] %v1677_v45  ;;  %v1050_v47 = vpop.f32.mrb[16].mxu1  ;;  %v734_v48 = vadd.f32 %v733_v46, %v2505_v22  ;;  %v735_v50 = vpop.f32.mrb[17].mxu0 }
 0x1d7   : > { %v1051_v49 = vadd.f32 %v1050_v47, %v2507_v23  ;;  %v1052_v51 = vpop.f32.mrb[17].mxu1  ;;  %v736_v52 = vadd.f32 %v735_v50, %v2509_v24  ;;  %v737_v54 = vpop.f32.mrb[18].mxu0 }
 0x1d8   : > { %v1053_v53 = vadd.f32 %v1052_v51, %v2511_v25  ;;  %v1054_v55 = vpop.f32.mrb[18].mxu1  ;;  %v738_v56 = vadd.f32 %v737_v54, %v2505_v22  ;;  %v739_v58 = vpop.f32.mrb[19].mxu0 }
 0x1d9   : > { %v1055_v57 = vadd.f32 %v1054_v55, %v2507_v23  ;;  %v1056_v59 = vpop.f32.mrb[19].mxu1  ;;  %v1662_v60 = vpack.c.bf16 %v736_v52, %v734_v48  ;;  %v740_v62 = vadd.f32 %v739_v58, %v2509_v24 }
 0x1da   : > { %v1678_v61 = vpack.c.bf16 %v1053_v53, %v1051_v49  ;;  %v1057_v63 = vadd.f32 %v1056_v59, %v2511_v25 }
 0x1db   : > { %1193 = vst [vmem:[%s2522_s29 + $0x40] sm:$0xff] %v1662_v60  ;;  %v1663_v0 = vpack.c.bf16 %v740_v62, %v738_v56 }
 0x1dc   : > { %1305 = vst [vmem:[%s2526_s7 + $0x40] sm:$0xff] %v1678_v61  ;;  %v1679_v1 = vpack.c.bf16 %v1057_v63, %v1055_v57 }
 0x1dd   : > { %1194 = vst [vmem:[%s2522_s29 + $0x48] sm:$0xff] %v1663_v0  ;;  %v743_v2 = vpop.f32.mrb[20].mxu0 }
 0x1de   : > { %1306 = vst [vmem:[%s2526_s7 + $0x48] sm:$0xff] %v1679_v1  ;;  %v1060_v3 = vpop.f32.mrb[20].mxu1  ;;  %v744_v4 = vadd.f32 %v743_v2, %v2505_v22  ;;  %v745_v6 = vpop.f32.mrb[21].mxu0 }
 0x1df   : > { %v1061_v5 = vadd.f32 %v1060_v3, %v2507_v23  ;;  %v1062_v7 = vpop.f32.mrb[21].mxu1  ;;  %v746_v8 = vadd.f32 %v745_v6, %v2509_v24  ;;  %v747_v10 = vpop.f32.mrb[22].mxu0 }
 0x1e0   : > { %v1063_v9 = vadd.f32 %v1062_v7, %v2511_v25  ;;  %v1064_v11 = vpop.f32.mrb[22].mxu1  ;;  %v748_v12 = vadd.f32 %v747_v10, %v2505_v22  ;;  %v749_v14 = vpop.f32.mrb[23].mxu0 }
 0x1e1   : > { %v1065_v13 = vadd.f32 %v1064_v11, %v2507_v23  ;;  %v1066_v15 = vpop.f32.mrb[23].mxu1  ;;  %v1664_v16 = vpack.c.bf16 %v746_v8, %v744_v4  ;;  %v750_v18 = vadd.f32 %v749_v14, %v2509_v24 }
 0x1e2   : > { %v1680_v17 = vpack.c.bf16 %v1063_v9, %v1061_v5  ;;  %v1067_v19 = vadd.f32 %v1066_v15, %v2511_v25 }
 0x1e3   : > { %1195 = vst [vmem:[%s2522_s29 + $0x50] sm:$0xff] %v1664_v16  ;;  %v1665_v20 = vpack.c.bf16 %v750_v18, %v748_v12 }
 0x1e4   : > { %1307 = vst [vmem:[%s2526_s7 + $0x50] sm:$0xff] %v1680_v17  ;;  %v1681_v21 = vpack.c.bf16 %v1067_v19, %v1065_v13 }
 0x1e5   : > { %1196 = vst [vmem:[%s2522_s29 + $0x58] sm:$0xff] %v1665_v20  ;;  %v753_v26 = vpop.f32.mrb[24].mxu0 }
 0x1e6   : > { %1308 = vst [vmem:[%s2526_s7 + $0x58] sm:$0xff] %v1681_v21  ;;  %v1070_v27 = vpop.f32.mrb[24].mxu1  ;;  %v754_v28 = vadd.f32 %v753_v26, %v2505_v22  ;;  %v755_v30 = vpop.f32.mrb[25].mxu0 }
 0x1e7   : > { %v1071_v29 = vadd.f32 %v1070_v27, %v2507_v23  ;;  %v1072_v31 = vpop.f32.mrb[25].mxu1  ;;  %v756_v32 = vadd.f32 %v755_v30, %v2509_v24  ;;  %v757_v34 = vpop.f32.mrb[26].mxu0 }
 0x1e8   : > { %v1073_v33 = vadd.f32 %v1072_v31, %v2511_v25  ;;  %v1074_v35 = vpop.f32.mrb[26].mxu1  ;;  %v758_v36 = vadd.f32 %v757_v34, %v2505_v22  ;;  %v759_v38 = vpop.f32.mrb[27].mxu0 }
 0x1e9   : > { %v1075_v37 = vadd.f32 %v1074_v35, %v2507_v23  ;;  %v1076_v39 = vpop.f32.mrb[27].mxu1  ;;  %v1666_v40 = vpack.c.bf16 %v756_v32, %v754_v28  ;;  %v760_v42 = vadd.f32 %v759_v38, %v2509_v24 }
 0x1ea   : > { %v1682_v41 = vpack.c.bf16 %v1073_v33, %v1071_v29  ;;  %v1077_v43 = vadd.f32 %v1076_v39, %v2511_v25 }
 0x1eb   : > { %1197 = vst [vmem:[%s2522_s29 + $0x60] sm:$0xff] %v1666_v40  ;;  %v1667_v44 = vpack.c.bf16 %v760_v42, %v758_v36 }
 0x1ec   : > { %1309 = vst [vmem:[%s2526_s7 + $0x60] sm:$0xff] %v1682_v41  ;;  %v1683_v45 = vpack.c.bf16 %v1077_v43, %v1075_v37 }
 0x1ed   : > { %1198 = vst [vmem:[%s2522_s29 + $0x68] sm:$0xff] %v1667_v44  ;;  %v763_v46 = vpop.f32.mrb[28].mxu0 }
 0x1ee   : > { %1310 = vst [vmem:[%s2526_s7 + $0x68] sm:$0xff] %v1683_v45  ;;  %v1080_v47 = vpop.f32.mrb[28].mxu1  ;;  %v764_v48 = vadd.f32 %v763_v46, %v2505_v22  ;;  %v765_v50 = vpop.f32.mrb[29].mxu0 }
 0x1ef   : > { %v1081_v49 = vadd.f32 %v1080_v47, %v2507_v23  ;;  %v1082_v51 = vpop.f32.mrb[29].mxu1  ;;  %v766_v52 = vadd.f32 %v765_v50, %v2509_v24  ;;  %v767_v54 = vpop.f32.mrb[30].mxu0 }
 0x1f0   : > { %v1083_v53 = vadd.f32 %v1082_v51, %v2511_v25  ;;  %v1084_v55 = vpop.f32.mrb[30].mxu1  ;;  %v768_v56 = vadd.f32 %v767_v54, %v2505_v22  ;;  %v769_v58 = vpop.f32.mrb[31].mxu0 }
 0x1f1   : > { %v1085_v57 = vadd.f32 %v1084_v55, %v2507_v23  ;;  %v1086_v59 = vpop.f32.mrb[31].mxu1  ;;  %v1668_v60 = vpack.c.bf16 %v766_v52, %v764_v48  ;;  %v770_v62 = vadd.f32 %v769_v58, %v2509_v24 }
 0x1f2   : > { %v1684_v61 = vpack.c.bf16 %v1083_v53, %v1081_v49  ;;  %v1087_v63 = vadd.f32 %v1086_v59, %v2511_v25 }
 0x1f3   : > { %1199 = vst [vmem:[%s2522_s29 + $0x70] sm:$0xff] %v1668_v60  ;;  %v1669_v22 = vpack.c.bf16 %v770_v62, %v768_v56 }
 0x1f4   : > { %1311 = vst [vmem:[%s2526_s7 + $0x70] sm:$0xff] %v1684_v61  ;;  %v1685_v23 = vpack.c.bf16 %v1087_v63, %v1085_v57 }
 0x1f5   : > { %1200 = vst [vmem:[%s2522_s29 + $0x78] sm:$0xff] %v1669_v22 }
 0x1f6   : > { %1312 = vst [vmem:[%s2526_s7 + $0x78] sm:$0xff] %v1685_v23 }
 0x1f7   : > { %2075 = shalt.err (!%p2072_p0)
}
 0x1f8   : > { %s2076_s29 = scalar_lea.hbm %s2616_s11, 2048  ;;  %s2080_s24 = scalar_lea.hbm %s2714_s5, 4096 }
 0x1f9   : > { %p2077_p4 = scmp.ne.s32.totalorder %s2616_s11, %s2076_s29  ;;  %p2081_p12 = scmp.lt.u32.totalorder %s2616_s11, %s2714_s5 }
 0x1fa   : > { %p2082_p1 = scmp.lt.u32.totalorder %s2080_s24, %s2076_s29  ;;  %p2084_p2 = scmp.lt.u32.totalorder %s2076_s29, %s2616_s11 }
 0x1fb   : > { %p2078_p13 = pnand %p2077_p4, %p2410_p5 }
 0x1fc   : > { %p2083_p11 = por %p2082_p1, %p2081_p12 }
 0x1fd   : > { %p2079_p6 = pneg %p2078_p13 }
 0x1fe   : > { %p2085_p8 = por %p2084_p2, %p2083_p11 }
 0x200   : > { %p2086_p10 = pnand %p2085_p8, %p2079_p6 }
 0x202   : > { %2089 = shalt.err (!%p2086_p10)
}
 0x203   : > { %s2194_s15 = smov 128   ;;  %s2195_s8 = smov 8  }
 0x204   : > { %1706 = dma.vmem_to_hbm [thread:$0]  (%p2410_p5), %s2619_s17, 2048, %s2616_s11, %s1314_s19, %s2194_s15, %s2194_s15, %s2195_s8  }
 0x205   : > { %s1319_s27 = scalar_lea.sflag [#allocation13], %s2468_s21  ;;  %s2090_s14 = scalar_lea.vmem %s2628_s16, 2048 }
 0x206   : > { %p2091_p3 = scmp.ne.s32.totalorder %s2628_s16, %s2090_s14  ;;  %s2196_s13 = smov [#allocation12]  }
 0x207   : > { %s2094_s29 = sshll.u32 %s2196_s13, 4  ;;  %s2095_s29 = int_to_ptr.vmem [resolvable:$false] %s2094_s29 }
 0x208   : > { %p2092_p7 = pnand %p2091_p3, %p2410_p5  ;;  %s2096_s7 = scalar_lea.vmem %s2095_s29, 4096 }
 0x209   : > { %p2097_p0 = scmp.lt.s32.totalorder %s2628_s16, %s2095_s29  ;;  %p2098_p4 = scmp.lt.s32.totalorder %s2096_s7, %s2090_s14 }
 0x20a   : > { %p2093_p9 = pneg %p2092_p7 }
 0x20b   : > { %p2099_p13 = por %p2098_p4, %p2097_p0 }
 0x20d   : > { %p2100_p6 = pnand %p2099_p13, %p2093_p9 }
 0x20f   : > { %2103 = shalt.err (!%p2100_p6)
}
 0x210   : > { %s2104_s17 = scalar_lea.hbm %s2626_s30, 2048  ;;  %s2108_s9 = scalar_lea.hbm %s2739_s20, 4096 }
 0x211   : > { %p2105_p12 = scmp.ne.s32.totalorder %s2626_s30, %s2104_s17  ;;  %p2109_p2 = scmp.lt.u32.totalorder %s2626_s30, %s2739_s20 }
 0x212   : > { %p2110_p8 = scmp.lt.u32.totalorder %s2108_s9, %s2104_s17  ;;  %p2112_p3 = scmp.lt.u32.totalorder %s2104_s17, %s2626_s30 }
 0x213   : > { %p2106_p1 = pnand %p2105_p12, %p2410_p5 }
 0x214   : > { %p2111_p10 = por %p2110_p8, %p2109_p2 }
 0x215   : > { %p2107_p11 = pneg %p2106_p1 }
 0x216   : > { %p2113_p7 = por %p2112_p3, %p2111_p10 }
 0x218   : > { %p2114_p9 = pnand %p2113_p7, %p2107_p11 }
 0x21a   : > { %2117 = shalt.err (!%p2114_p9)
}
 0x21b   : > { %1707 = dma.vmem_to_hbm [thread:$0]  (%p2410_p5), %s2628_s16, 2048, %s2626_s30, %s1319_s27, %s2194_s15, %s2194_s15, %s2195_s8  }
 0x21c PF: > { %s2740_s6 = sld [smem:[#allocation19_spill]]  ;;  %s2741_s14 = sld [smem:[#allocation20_spill]] }
 0x21d   : > { %p2743_p4 = scmp.ge.s32.totalorder %s2184_s26, 2 }
 0x222   : > { %s1369_s13 = sand.u32 1, %s2740_s6   ;;  %p2742_p0 = scmp.ne.s32.totalorder %s2741_s14, 0 }
 0x223   : > { %s1370_s29 = scalar_lea.sflag [#allocation4], %s1369_s13 }
 0x224   : > { %p1728_p13 = pnand %p2743_p4, %p2742_p0 }
 0x226   : > { %2155 = dma.done.wait (!%p1728_p13), %s1370_s29, 2048  }
 0x227   : > { %2157 = vsyncadd (!%p1728_p13), %s1370_s29, 4294965248  ;;  %s1379_s12 = scalar_lea.sflag [#allocation13], %s1369_s13 }
 0x228   : > { %2159 = dma.done.wait (!%p1728_p13), %s1379_s12, 2048  }
 0x229   : > { %2161 = vsyncadd (!%p1728_p13), %s1379_s12, 4294965248  ;;  %s28_s26 = sadd.s32 1, %s2184_s26   ;;  %s2744_s21 = smov %s2168_s22 }
 0x22a   : > { %p25_p6 = scmp.ge.s32.totalorder %s28_s26, 4   ;;  %s2745_s22 = smov %s2172_s23 }
 0x22b   : > { %s2746_s23 = smov %s2419_s10  ;;  %s2747_s24 = smov %s2180_s25 }
 0x22c   : > { %s2748_s25 = smov %s2750_s28  ;;  %27 = sbr.rel (!%p25_p6) target bundleno = 12 (0xc), region = 118 }
 0x233   :  { %1384 = vsyncpa [#allocation3], 1 }
 0x234   :  { %1386 = vsyncpa [#allocation3 + $0x1], 1 }
 0x235   :  { %1387 = vsyncpa [#allocation6], 1 }
 0x236   :  { %1388 = vsyncpa [#allocation9], 1 }
 0x237   :  { %1389 = vsyncpa [#allocation4], 1 }
 0x238   :  { %1391 = vsyncpa [#allocation4 + $0x1], 1 }
 0x239   :  { %1392 = vsyncpa [#allocation13], 1 }
 0x23a   :  { %1394 = vsyncpa [#allocation13 + $0x1], 1 }

</bundles_post_ra>
